<compile_context>
chip_gen: v7x
topology: tpu7x:2x2x1
jax: 0.10.0
libtpu: 0.0.40
codegen_flags: <defaults>
</compile_context>

<pallas_src>
import functools

import jax
import jax.numpy as jnp
from jax.experimental import pallas as pl
from jax.experimental.pallas import tpu as pltpu

DT = 0.01     # BRF / LI integration step
GAMMA = 0.9   # BRF refractory decay


def quantize(x, f):
    """quantize_tensor(x, f): fixed point with f fractional bits."""
    scale = 2.0 ** f
    return jnp.round(x * scale) / scale


def _round_up(x, m):
    return ((x + m - 1) // m) * m


def brf_rsnn_kernel(xp_ref, wf_ref, omega_ref, bbase_ref, alpha_ref, oma_ref,
                    out_seq_ref, hz_ref, hu_ref, outu_ref, nspk_ref,
                    v_s, q_s, spk_s, rcur_s,
                    *, chunk, hpad, bit_precision, unroll):
    c = pl.program_id(1)          # time-chunk index (serial axis)

    @pl.when(c == 0)
    def _():                      # fresh state at the start of each batch block
        hz_ref[...] = jnp.zeros_like(hz_ref)
        hu_ref[...] = jnp.zeros_like(hu_ref)
        outu_ref[...] = jnp.zeros_like(outu_ref)
        v_s[...] = jnp.zeros_like(v_s)
        q_s[...] = jnp.zeros_like(q_s)
        spk_s[...] = jnp.zeros_like(spk_s)
        rcur_s[...] = jnp.zeros_like(rcur_s)   # z0 = 0  ->  z0 @ Wz = 0

    # Loop-invariant parameters (pre-computed & padded in the wrapper).
    omega = omega_ref[...]        # (1, H_pad)  |omega|
    b_base = bbase_ref[...]       # (1, H_pad)  p(omega) - |b_offset|
    alpha = alpha_ref[...]        # (1, O_pad)  exp(-dt / |tau_mem|)
    one_m_alpha = oma_ref[...]    # (1, O_pad)
    wf = wf_ref[...]              # (H_pad, H_pad+O_pad)  fused [Wz | Wo], bf16

    def step(lt, carry):
        z, rcur, u, v, q, ou, spk = carry
        # BRFCell input current: pre-projected x@Wx row + carried z_{t-1}@Wz.
        cur = xp_ref[lt].astype(jnp.float32) + rcur
        b = b_base - q                                   # effective dampening
        u_new = u + DT * (b * u - omega * v + cur)
        v_new = v + DT * (omega * u + b * v)
        fire = u_new - (1.0 + q) > 0.0                   # Heaviside spike
        z_new = fire.astype(jnp.float32)
        q_new = GAMMA * q + z_new
        spk_new = spk + z_new                            # exact per-neuron count

        # Single fused MXU push: z_t @ [Wz | Wo]  (spikes exact 0/1 in bf16).
        r = jnp.dot(fire.astype(wf.dtype), wf,
                    preferred_element_type=jnp.float32)
        rcur_new = r[:, :hpad]                           # next step's recurrent cur
        o_in = r[:, hpad:]                               # LI readout input

        # LICellBP readout: out_u = alpha*out_u + (1-alpha)*(z @ W_o.T), quantized.
        ou_new = alpha * ou + one_m_alpha * o_in
        if bit_precision < 24:     # fixed-point round is a no-op in f32 otherwise
            scale = 2.0 ** bit_precision
            ou_new = jnp.round(ou_new * scale) / scale

        out_seq_ref[lt] = ou_new   # lane-dense row store (O padded to 128)
        return z_new, rcur_new, u_new, v_new, q_new, ou_new, spk_new

    init = (hz_ref[...], rcur_s[...], hu_ref[...], v_s[...], q_s[...],
            outu_ref[...], jnp.zeros(v_s.shape, jnp.float32))
    z, rcur, u, v, q, ou, spk = jax.lax.fori_loop(
        0, chunk, step, init, unroll=unroll)

    # Carry state across time chunks: resident output blocks + VMEM scratch.
    hz_ref[...] = z
    hu_ref[...] = u
    outu_ref[...] = ou
    v_s[...] = v
    q_s[...] = q
    rcur_s[...] = rcur
    spk_total = spk_s[...] + spk
    spk_s[...] = spk_total

    @pl.when(c == pl.num_programs(1) - 1)
    def _():
        nspk_ref[0] = jnp.sum(spk_total, keepdims=True)   # single reduce / batch blk


def brf_rsnn_bp_forward(x, params, *, bit_precision=52, sub_seq_length=0,
                        label_last=False, time_chunk=None, batch_tile=None,
                        use_bf16=True):
    T, B, I = x.shape
    wx, wz, wo, omega, boff, tau = params
    H = wx.shape[1]
    O = wo.shape[1]

    x = x.astype(jnp.float32)
    if bit_precision < 24:          # quantize_tensor is identity in f32 otherwise
        x = quantize(x, bit_precision)

    # ---- hoisted, time-invariant parameter math (runs once, in XLA) ----
    omega_abs = jnp.abs(omega)                                      # (1, H)
    p_omega = (-1.0 + jnp.sqrt(1.0 - (DT * omega_abs) ** 2)) / DT
    b_base = p_omega - jnp.abs(boff)                                # (1, H)
    alpha = jnp.exp(-DT / jnp.abs(tau))                             # (1, O)
    one_m_alpha = 1.0 - alpha

    # ---- lane/sublane padding (padded neurons/rows provably stay silent) ----
    H_pad = _round_up(H, 128)
    O_pad = _round_up(O, 128)
    b_mult = 16 if use_bf16 else 8
    B_pad = _round_up(B, b_mult)
    Bt = batch_tile if batch_tile is not None else B_pad
    assert B_pad % Bt == 0 and Bt % b_mult == 0
    nb = B_pad // Bt

    xdt = jnp.bfloat16 if use_bf16 else jnp.float32
    wdt = jnp.bfloat16 if use_bf16 else jnp.float32

    # ---- input projection x @ Wx for ALL timesteps: one big matmul, bf16 stream
    xproj = jnp.dot(x.reshape(T * B, I), wx,
                    preferred_element_type=jnp.float32).reshape(T, B, H)
    xproj = jnp.pad(xproj, ((0, 0), (0, B_pad - B), (0, H_pad - H))).astype(xdt)

    # ---- fused recurrent + readout weight  [Wz | Wo]  (one MXU push per step)
    wz_p = jnp.pad(wz, ((0, H_pad - H), (0, H_pad - H)))
    wo_p = jnp.pad(wo, ((0, H_pad - H), (0, O_pad - O)))
    wfused = jnp.concatenate([wz_p, wo_p], axis=1).astype(wdt)

    omega_p = jnp.pad(omega_abs, ((0, 0), (0, H_pad - H)))
    bbase_p = jnp.pad(b_base, ((0, 0), (0, H_pad - H)))
    alpha_p = jnp.pad(alpha, ((0, 0), (0, O_pad - O)))
    oma_p = jnp.pad(one_m_alpha, ((0, 0), (0, O_pad - O)))

    # ---- time-chunk size from a VMEM budget (safe on v7x's 64 MiB VMEM) ----
    VMEM_LIMIT = 56 * 1024 * 1024
    x_bytes = 2 if use_bf16 else 4
    per_step = 2 * Bt * (H_pad * x_bytes + O_pad * 4)   # dbl-buffered in + out row
    fixed = (2 * wfused.size * (2 if use_bf16 else 4)   # dbl-buffered weights
             + 8 * Bt * (H_pad + O_pad) * 4)            # resident state + scratch
    budget = max(per_step, VMEM_LIMIT - fixed - (4 << 20))
    if time_chunk is None:
        cap = max(1, min(T, 256, budget // per_step))
        Tc = next(c for c in range(cap, 0, -1) if T % c == 0)
    else:
        Tc = time_chunk
    assert T % Tc == 0, "time_chunk must divide the sequence length"
    n_chunks = T // Tc
    unroll = max(1, min(Tc, 8))        # partial unroll: scheduler visibility

    out_shapes = (
        jax.ShapeDtypeStruct((T, B_pad, O_pad), jnp.float32),   # per-step readout
        jax.ShapeDtypeStruct((B_pad, H_pad), jnp.float32),      # hidden_z
        jax.ShapeDtypeStruct((B_pad, H_pad), jnp.float32),      # hidden_u
        jax.ShapeDtypeStruct((B_pad, O_pad), jnp.float32),      # out_u
        jax.ShapeDtypeStruct((nb, 1, 1), jnp.float32),          # spikes / batch blk
    )
    in_specs = [
        pl.BlockSpec((Tc, Bt, H_pad), lambda b, c: (c, b, 0)),          # x @ Wx
        pl.BlockSpec((H_pad, H_pad + O_pad), lambda b, c: (0, 0)),      # [Wz|Wo]
        pl.BlockSpec((1, H_pad), lambda b, c: (0, 0)),                  # |omega|
        pl.BlockSpec((1, H_pad), lambda b, c: (0, 0)),                  # b_base
        pl.BlockSpec((1, O_pad), lambda b, c: (0, 0)),                  # alpha
        pl.BlockSpec((1, O_pad), lambda b, c: (0, 0)),                  # 1 - alpha
    ]
    out_specs = [
        pl.BlockSpec((Tc, Bt, O_pad), lambda b, c: (c, b, 0)),          # readout
        pl.BlockSpec((Bt, H_pad), lambda b, c: (b, 0)),                 # z (resident)
        pl.BlockSpec((Bt, H_pad), lambda b, c: (b, 0)),                 # u (resident)
        pl.BlockSpec((Bt, O_pad), lambda b, c: (b, 0)),                 # out_u
        pl.BlockSpec((1, 1, 1), lambda b, c: (b, 0, 0)),                # num_spikes
    ]
    scratch = [
        pltpu.VMEM((Bt, H_pad), jnp.float32),   # v
        pltpu.VMEM((Bt, H_pad), jnp.float32),   # q
        pltpu.VMEM((Bt, H_pad), jnp.float32),   # per-neuron spike counts
        pltpu.VMEM((Bt, H_pad), jnp.float32),   # carried recurrent current z@Wz
    ]

    outputs_seq, hz, hu, out_u, nspk = pl.pallas_call(
        functools.partial(brf_rsnn_kernel, chunk=Tc, hpad=H_pad,
                          bit_precision=bit_precision, unroll=unroll),
        out_shape=out_shapes,
        grid_spec=pltpu.PrefetchScalarGridSpec(
            num_scalar_prefetch=0,
            grid=(nb, n_chunks),             # (parallel batch, serial time)
            in_specs=in_specs,
            out_specs=out_specs,
            scratch_shapes=scratch,
        ),
        compiler_params=pltpu.CompilerParams(
            dimension_semantics=("parallel", "arbitrary"),
            vmem_limit_bytes=VMEM_LIMIT,
        ),
    )(xproj, wfused, omega_p, bbase_p, alpha_p, oma_p)

    outputs = outputs_seq[sub_seq_length:, :B, :O]
    if label_last:
        outputs = outputs[-1:, :, :]
    hz = hz[:B, :H]
    hu = hu[:B, :H]
    out_u = out_u[:B, :O]
    num_spikes = jnp.sum(nspk)   # torch does per-step .item(); device scalar here
    return outputs, ((hz, hu), out_u), num_spikes


def brf_rsnn_reference(x, params, *, bit_precision=52):
    """Pure-JAX f32 reference mirroring the PyTorch forward (for validation)."""
    T, B, _ = x.shape
    wx, wz, wo, omega, boff, tau = params
    H = wx.shape[1]
    O = wo.shape[1]
    x = x.astype(jnp.float32)
    if bit_precision < 24:
        x = quantize(x, bit_precision)
    omega_abs = jnp.abs(omega)
    p_omega = (-1.0 + jnp.sqrt(1.0 - (DT * omega_abs) ** 2)) / DT
    b_base = p_omega - jnp.abs(boff)
    alpha = jnp.exp(-DT / jnp.abs(tau))
    z = jnp.zeros((B, H)); u = jnp.zeros((B, H))
    v = jnp.zeros((B, H)); q = jnp.zeros((B, H))
    ou = jnp.zeros((B, O))
    nspk = jnp.asarray(0.0)
    outs = []
    for t in range(T):
        cur = x[t] @ wx + z @ wz
        b = b_base - q
        u_new = u + DT * (b * u - omega_abs * v + cur)
        v_new = v + DT * (omega_abs * u + b * v)
        z = (u_new - (1.0 + q) > 0.0).astype(jnp.float32)
        q = GAMMA * q + z
        u, v = u_new, v_new
        nspk = nspk + jnp.sum(z)
        ou = alpha * ou + (1.0 - alpha) * (z @ wo)
        if bit_precision < 24:
            ou = quantize(ou, bit_precision)
        outs.append(ou)
    return jnp.stack(outs), ((z, u), ou), nspk


def init_params(key, input_size, hidden_size, output_size):
    """Deterministic init mirroring the module's __init__ shapes/distributions."""
    ks = jax.random.split(key, 5)
    fan_in = float(input_size + hidden_size)
    bound_h = 1.0 / (fan_in ** 0.5)
    # BRFCell linear: (hidden, input+hidden), no bias
    W_h = jax.random.uniform(ks[0], (hidden_size, input_size + hidden_size),
                             minval=-bound_h, maxval=bound_h, dtype=jnp.float32)
    # split & transpose so the kernel computes x @ Wx + z @ Wz == cat(x, z) @ W_h.T
    wx = jnp.asarray(W_h[:, :input_size].T)
    wz = jnp.asarray(W_h[:, input_size:].T)
    omega = jax.random.uniform(ks[1], (1, hidden_size),
                               minval=5.0, maxval=10.0, dtype=jnp.float32)
    boff = jax.random.uniform(ks[2], (1, hidden_size),
                              minval=0.0, maxval=1.0, dtype=jnp.float32)
    # LICellBP linear: (output, hidden), no bias; tau_mem ~ N(20, 5)
    bound_o = 1.0 / (float(hidden_size) ** 0.5)
    W_o = jax.random.uniform(ks[3], (output_size, hidden_size),
                             minval=-bound_o, maxval=bound_o, dtype=jnp.float32)
    wo = jnp.asarray(W_o.T)
    tau = 20.0 + 5.0 * jax.random.normal(ks[4], (1, output_size), dtype=jnp.float32)
    return wx, wz, wo, omega, boff, tau


if __name__ == "__main__":
    key = jax.random.PRNGKey(0)
    T, B, I, H, O = 8, 4, 16, 32, 8   # seq=8, batch=4, input=16, hidden=32, output=8

    kx, kp = jax.random.split(key)
    x = jax.random.normal(kx, (T, B, I), dtype=jnp.float32)
    params = init_params(kp, I, H, O)

    # time_chunk=4 -> grid of 2 time chunks, exercising the cross-chunk state carry.
    outputs, ((hidden_z, hidden_u), out_u), num_spikes = brf_rsnn_bp_forward(
        x, params, bit_precision=52, time_chunk=4)
    jax.block_until_ready((outputs, hidden_z, hidden_u, out_u, num_spikes))

    assert outputs.shape == (T, B, O)
    assert hidden_z.shape == (B, H) and hidden_u.shape == (B, H)
    assert out_u.shape == (B, O)
    assert num_spikes.shape == ()
    assert bool(jnp.all(jnp.isfinite(outputs)))
    assert bool(jnp.all(jnp.isfinite(hidden_u)))

    # Validate against the pure-JAX f32 reference (bf16 weight/input streaming
    # introduces small, bounded differences).
    r_out, ((r_z, r_u), r_ou), r_ns = brf_rsnn_reference(x, params)
    assert bool(jnp.allclose(outputs, r_out, rtol=2e-2, atol=1e-3))
    assert bool(jnp.allclose(hidden_u, r_u, rtol=2e-2, atol=1e-3))
    assert bool(jnp.allclose(out_u, r_ou, rtol=2e-2, atol=1e-3))
    assert bool(jnp.allclose(num_spikes, r_ns, atol=0.5))

    print("KERNEL_OK")
</pallas_src>

<mosaic_0001>
module attributes {stable_mosaic.version = 11 : i64} {
  func.func @brf_rsnn_kernel(%arg0: i32, %arg1: i32, %arg2: memref<4x16x128xbf16, #tpu.memory_space<vmem>>, %arg3: memref<128x256xbf16, #tpu.memory_space<vmem>>, %arg4: memref<1x128xf32, #tpu.memory_space<vmem>>, %arg5: memref<1x128xf32, #tpu.memory_space<vmem>>, %arg6: memref<1x128xf32, #tpu.memory_space<vmem>>, %arg7: memref<1x128xf32, #tpu.memory_space<vmem>>, %arg8: memref<4x16x128xf32, #tpu.memory_space<vmem>>, %arg9: memref<16x128xf32, #tpu.memory_space<vmem>>, %arg10: memref<16x128xf32, #tpu.memory_space<vmem>>, %arg11: memref<16x128xf32, #tpu.memory_space<vmem>>, %arg12: memref<1x1x1xf32, #tpu.memory_space<vmem>>, %arg13: memref<16x128xf32, #tpu.memory_space<vmem>>, %arg14: memref<16x128xf32, #tpu.memory_space<vmem>>, %arg15: memref<16x128xf32, #tpu.memory_space<vmem>>, %arg16: memref<16x128xf32, #tpu.memory_space<vmem>>) attributes {dimension_semantics = [#tpu.dimension_semantics<parallel>, #tpu.dimension_semantics<arbitrary>], iteration_bounds = array<i64: 1, 2>, scalar_prefetch = 0 : i64, scratch_operands = 4 : i64, tpu.core_type = #tpu.core_type<tc>, window_params = [{transform_indices = @transform_0, window_bounds = array<i64: 4, 16, 128>}, {pipeline_mode = #tpu.pipeline_mode<synchronous>, transform_indices = @transform_1, window_bounds = array<i64: 128, 256>}, {pipeline_mode = #tpu.pipeline_mode<synchronous>, transform_indices = @transform_2, window_bounds = array<i64: 1, 128>}, {pipeline_mode = #tpu.pipeline_mode<synchronous>, transform_indices = @transform_3, window_bounds = array<i64: 1, 128>}, {pipeline_mode = #tpu.pipeline_mode<synchronous>, transform_indices = @transform_4, window_bounds = array<i64: 1, 128>}, {pipeline_mode = #tpu.pipeline_mode<synchronous>, transform_indices = @transform_5, window_bounds = array<i64: 1, 128>}, {transform_indices = @transform_6, window_bounds = array<i64: 4, 16, 128>}, {transform_indices = @transform_7, window_bounds = array<i64: 16, 128>}, {transform_indices = @transform_8, window_bounds = array<i64: 16, 128>}, {transform_indices = @transform_9, window_bounds = array<i64: 16, 128>}, {transform_indices = @transform_10, window_bounds = array<i64: 1, 1, 1>}]} {
    %c0_i32 = arith.constant 0 : i32
    %0 = arith.cmpi eq, %arg1, %c0_i32 : i32
    %1 = arith.extui %0 : i1 to i32
    %c0_i32_0 = arith.constant 0 : i32
    %2 = arith.cmpi ne, %1, %c0_i32_0 : i32
    scf.if %2 {
      %cst_81 = arith.constant 0.000000e+00 : f32
      %219 = vector.broadcast %cst_81 : f32 to vector<16x128xf32>
      %c0_82 = arith.constant 0 : index
      %c0_83 = arith.constant 0 : index
      %220 = vector.load %arg9[%c0_82, %c0_83] : memref<16x128xf32, #tpu.memory_space<vmem>>, vector<16x128xf32>
      tpu.vector_store %arg9[%c0_82, %c0_83], %219 {strides = array<i32>} : memref<16x128xf32, #tpu.memory_space<vmem>>, vector<16x128xf32>,
      %cst_84 = arith.constant 0.000000e+00 : f32
      %221 = vector.broadcast %cst_84 : f32 to vector<16x128xf32>
      %c0_85 = arith.constant 0 : index
      %c0_86 = arith.constant 0 : index
      %222 = vector.load %arg10[%c0_85, %c0_86] : memref<16x128xf32, #tpu.memory_space<vmem>>, vector<16x128xf32>
      tpu.vector_store %arg10[%c0_85, %c0_86], %221 {strides = array<i32>} : memref<16x128xf32, #tpu.memory_space<vmem>>, vector<16x128xf32>,
      %cst_87 = arith.constant 0.000000e+00 : f32
      %223 = vector.broadcast %cst_87 : f32 to vector<16x128xf32>
      %c0_88 = arith.constant 0 : index
      %c0_89 = arith.constant 0 : index
      %224 = vector.load %arg11[%c0_88, %c0_89] : memref<16x128xf32, #tpu.memory_space<vmem>>, vector<16x128xf32>
      tpu.vector_store %arg11[%c0_88, %c0_89], %223 {strides = array<i32>} : memref<16x128xf32, #tpu.memory_space<vmem>>, vector<16x128xf32>,
      %cst_90 = arith.constant 0.000000e+00 : f32
      %225 = vector.broadcast %cst_90 : f32 to vector<16x128xf32>
      %c0_91 = arith.constant 0 : index
      %c0_92 = arith.constant 0 : index
      %226 = vector.load %arg13[%c0_91, %c0_92] : memref<16x128xf32, #tpu.memory_space<vmem>>, vector<16x128xf32>
      tpu.vector_store %arg13[%c0_91, %c0_92], %225 {strides = array<i32>} : memref<16x128xf32, #tpu.memory_space<vmem>>, vector<16x128xf32>,
      %cst_93 = arith.constant 0.000000e+00 : f32
      %227 = vector.broadcast %cst_93 : f32 to vector<16x128xf32>
      %c0_94 = arith.constant 0 : index
      %c0_95 = arith.constant 0 : index
      %228 = vector.load %arg14[%c0_94, %c0_95] : memref<16x128xf32, #tpu.memory_space<vmem>>, vector<16x128xf32>
      tpu.vector_store %arg14[%c0_94, %c0_95], %227 {strides = array<i32>} : memref<16x128xf32, #tpu.memory_space<vmem>>, vector<16x128xf32>,
      %cst_96 = arith.constant 0.000000e+00 : f32
      %229 = vector.broadcast %cst_96 : f32 to vector<16x128xf32>
      %c0_97 = arith.constant 0 : index
      %c0_98 = arith.constant 0 : index
      %230 = vector.load %arg15[%c0_97, %c0_98] : memref<16x128xf32, #tpu.memory_space<vmem>>, vector<16x128xf32>
      tpu.vector_store %arg15[%c0_97, %c0_98], %229 {strides = array<i32>} : memref<16x128xf32, #tpu.memory_space<vmem>>, vector<16x128xf32>,
      %cst_99 = arith.constant 0.000000e+00 : f32
      %231 = vector.broadcast %cst_99 : f32 to vector<16x128xf32>
      %c0_100 = arith.constant 0 : index
      %c0_101 = arith.constant 0 : index
      %232 = vector.load %arg16[%c0_100, %c0_101] : memref<16x128xf32, #tpu.memory_space<vmem>>, vector<16x128xf32>
      tpu.vector_store %arg16[%c0_100, %c0_101], %231 {strides = array<i32>} : memref<16x128xf32, #tpu.memory_space<vmem>>, vector<16x128xf32>,
    } else {
    }
    %c0 = arith.constant 0 : index
    %c0_1 = arith.constant 0 : index
    %3 = vector.load %arg4[%c0, %c0_1] : memref<1x128xf32, #tpu.memory_space<vmem>>, vector<1x128xf32>
    %c0_2 = arith.constant 0 : index
    %c0_3 = arith.constant 0 : index
    %4 = vector.load %arg5[%c0_2, %c0_3] : memref<1x128xf32, #tpu.memory_space<vmem>>, vector<1x128xf32>
    %c0_4 = arith.constant 0 : index
    %c0_5 = arith.constant 0 : index
    %5 = vector.load %arg6[%c0_4, %c0_5] : memref<1x128xf32, #tpu.memory_space<vmem>>, vector<1x128xf32>
    %c0_6 = arith.constant 0 : index
    %c0_7 = arith.constant 0 : index
    %6 = vector.load %arg7[%c0_6, %c0_7] : memref<1x128xf32, #tpu.memory_space<vmem>>, vector<1x128xf32>
    %c0_8 = arith.constant 0 : index
    %c0_9 = arith.constant 0 : index
    %7 = vector.load %arg3[%c0_8, %c0_9] : memref<128x256xbf16, #tpu.memory_space<vmem>>, vector<128x256xbf16>
    %c0_10 = arith.constant 0 : index
    %c0_11 = arith.constant 0 : index
    %8 = vector.load %arg9[%c0_10, %c0_11] : memref<16x128xf32, #tpu.memory_space<vmem>>, vector<16x128xf32>
    %c0_12 = arith.constant 0 : index
    %c0_13 = arith.constant 0 : index
    %9 = vector.load %arg16[%c0_12, %c0_13] : memref<16x128xf32, #tpu.memory_space<vmem>>, vector<16x128xf32>
    %c0_14 = arith.constant 0 : index
    %c0_15 = arith.constant 0 : index
    %10 = vector.load %arg10[%c0_14, %c0_15] : memref<16x128xf32, #tpu.memory_space<vmem>>, vector<16x128xf32>
    %c0_16 = arith.constant 0 : index
    %c0_17 = arith.constant 0 : index
    %11 = vector.load %arg13[%c0_16, %c0_17] : memref<16x128xf32, #tpu.memory_space<vmem>>, vector<16x128xf32>
    %c0_18 = arith.constant 0 : index
    %c0_19 = arith.constant 0 : index
    %12 = vector.load %arg14[%c0_18, %c0_19] : memref<16x128xf32, #tpu.memory_space<vmem>>, vector<16x128xf32>
    %c0_20 = arith.constant 0 : index
    %c0_21 = arith.constant 0 : index
    %13 = vector.load %arg11[%c0_20, %c0_21] : memref<16x128xf32, #tpu.memory_space<vmem>>, vector<16x128xf32>
    %cst = arith.constant 0.000000e+00 : f32
    %14 = vector.broadcast %cst : f32 to vector<16x128xf32>
    %c0_i32_22 = arith.constant 0 : i32
    %15 = arith.index_cast %c0_i32_22 : i32 to index
    %c0_23 = arith.constant 0 : index
    %c0_24 = arith.constant 0 : index
    %16 = vector.load %arg2[%15, %c0_23, %c0_24] : memref<4x16x128xbf16, #tpu.memory_space<vmem>>, vector<1x16x128xbf16>
    %17 = vector.shape_cast %16 : vector<1x16x128xbf16> to vector<16x128xbf16>
    %18 = arith.extf %17 : vector<16x128xbf16> to vector<16x128xf32>
    %19 = arith.addf %18, %9 : vector<16x128xf32>
    %20 = vector.broadcast %4 : vector<1x128xf32> to vector<16x128xf32>
    %21 = arith.subf %20, %12 : vector<16x128xf32>
    %22 = arith.mulf %21, %10 : vector<16x128xf32>
    %23 = vector.broadcast %3 : vector<1x128xf32> to vector<16x128xf32>
    %24 = arith.mulf %23, %11 : vector<16x128xf32>
    %25 = arith.subf %22, %24 : vector<16x128xf32>
    %26 = arith.addf %25, %19 : vector<16x128xf32>
    %cst_25 = arith.constant 0.00999999977 : f32
    %27 = vector.broadcast %cst_25 : f32 to vector<16x128xf32>
    %28 = arith.mulf %27, %26 : vector<16x128xf32>
    %29 = arith.addf %10, %28 : vector<16x128xf32>
    %30 = vector.broadcast %3 : vector<1x128xf32> to vector<16x128xf32>
    %31 = arith.mulf %30, %10 : vector<16x128xf32>
    %32 = arith.mulf %21, %11 : vector<16x128xf32>
    %33 = arith.addf %31, %32 : vector<16x128xf32>
    %cst_26 = arith.constant 0.00999999977 : f32
    %34 = vector.broadcast %cst_26 : f32 to vector<16x128xf32>
    %35 = arith.mulf %34, %33 : vector<16x128xf32>
    %36 = arith.addf %11, %35 : vector<16x128xf32>
    %cst_27 = arith.constant 1.000000e+00 : f32
    %37 = vector.broadcast %cst_27 : f32 to vector<16x128xf32>
    %38 = arith.addf %37, %12 : vector<16x128xf32>
    %39 = arith.subf %29, %38 : vector<16x128xf32>
    %cst_28 = arith.constant 0.000000e+00 : f32
    %40 = vector.broadcast %cst_28 : f32 to vector<16x128xf32>
    %41 = arith.cmpf ogt, %39, %40 : vector<16x128xf32>
    %42 = arith.extui %41 : vector<16x128xi1> to vector<16x128xi32>
    %43 = arith.sitofp %42 : vector<16x128xi32> to vector<16x128xf32>
    %cst_29 = arith.constant 0.899999976 : f32
    %44 = vector.broadcast %cst_29 : f32 to vector<16x128xf32>
    %45 = arith.mulf %44, %12 : vector<16x128xf32>
    %46 = arith.addf %45, %43 : vector<16x128xf32>
    %47 = arith.addf %14, %43 : vector<16x128xf32>
    %48 = arith.extui %41 : vector<16x128xi1> to vector<16x128xi32>
    %49 = arith.sitofp %48 : vector<16x128xi32> to vector<16x128xf32>
    %50 = arith.truncf %49 : vector<16x128xf32> to vector<16x128xbf16>
    %cst_30 = arith.constant dense<0.000000e+00> : vector<16x256xf32>
    %51 = tpu.matmul %50, %7, %cst_30 {dimension_numbers = #tpu.dot_dimension_numbers<[1], [0], [0], [1], [0, 0, 1, 1], [], []>} : vector<16x128xbf16>, vector<128x256xbf16>, vector<16x256xf32> -> vector<16x256xf32>
    %52 = vector.extract_strided_slice %51 {offsets = [0, 0], sizes = [16, 128], strides = [1, 1]} : vector<16x256xf32> to vector<16x128xf32>
    %53 = vector.extract_strided_slice %51 {offsets = [0, 128], sizes = [16, 128], strides = [1, 1]} : vector<16x256xf32> to vector<16x128xf32>
    %54 = vector.broadcast %5 : vector<1x128xf32> to vector<16x128xf32>
    %55 = arith.mulf %54, %13 : vector<16x128xf32>
    %56 = vector.broadcast %6 : vector<1x128xf32> to vector<16x128xf32>
    %57 = arith.mulf %56, %53 : vector<16x128xf32>
    %58 = arith.addf %55, %57 : vector<16x128xf32>
    %59 = arith.index_cast %c0_i32_22 : i32 to index
    %c0_31 = arith.constant 0 : index
    %c0_32 = arith.constant 0 : index
    %60 = vector.load %arg8[%59, %c0_31, %c0_32] : memref<4x16x128xf32, #tpu.memory_space<vmem>>, vector<1x16x128xf32>
    %61 = vector.shape_cast %60 : vector<1x16x128xf32> to vector<16x128xf32>
    %62 = vector.shape_cast %58 : vector<16x128xf32> to vector<1x16x128xf32>
    tpu.vector_store %arg8[%59, %c0_31, %c0_32], %62 {strides = array<i32>} : memref<4x16x128xf32, #tpu.memory_space<vmem>>, vector<1x16x128xf32>,
    %c1_i32 = arith.constant 1 : i32
    %63 = arith.index_cast %c1_i32 : i32 to index
    %c0_33 = arith.constant 0 : index
    %c0_34 = arith.constant 0 : index
    %64 = vector.load %arg2[%63, %c0_33, %c0_34] : memref<4x16x128xbf16, #tpu.memory_space<vmem>>, vector<1x16x128xbf16>
    %65 = vector.shape_cast %64 : vector<1x16x128xbf16> to vector<16x128xbf16>
    %66 = arith.extf %65 : vector<16x128xbf16> to vector<16x128xf32>
    %67 = arith.addf %66, %52 : vector<16x128xf32>
    %68 = vector.broadcast %4 : vector<1x128xf32> to vector<16x128xf32>
    %69 = arith.subf %68, %46 : vector<16x128xf32>
    %70 = arith.mulf %69, %29 : vector<16x128xf32>
    %71 = vector.broadcast %3 : vector<1x128xf32> to vector<16x128xf32>
    %72 = arith.mulf %71, %36 : vector<16x128xf32>
    %73 = arith.subf %70, %72 : vector<16x128xf32>
    %74 = arith.addf %73, %67 : vector<16x128xf32>
    %cst_35 = arith.constant 0.00999999977 : f32
    %75 = vector.broadcast %cst_35 : f32 to vector<16x128xf32>
    %76 = arith.mulf %75, %74 : vector<16x128xf32>
    %77 = arith.addf %29, %76 : vector<16x128xf32>
    %78 = vector.broadcast %3 : vector<1x128xf32> to vector<16x128xf32>
    %79 = arith.mulf %78, %29 : vector<16x128xf32>
    %80 = arith.mulf %69, %36 : vector<16x128xf32>
    %81 = arith.addf %79, %80 : vector<16x128xf32>
    %cst_36 = arith.constant 0.00999999977 : f32
    %82 = vector.broadcast %cst_36 : f32 to vector<16x128xf32>
    %83 = arith.mulf %82, %81 : vector<16x128xf32>
    %84 = arith.addf %36, %83 : vector<16x128xf32>
    %cst_37 = arith.constant 1.000000e+00 : f32
    %85 = vector.broadcast %cst_37 : f32 to vector<16x128xf32>
    %86 = arith.addf %85, %46 : vector<16x128xf32>
    %87 = arith.subf %77, %86 : vector<16x128xf32>
    %cst_38 = arith.constant 0.000000e+00 : f32
    %88 = vector.broadcast %cst_38 : f32 to vector<16x128xf32>
    %89 = arith.cmpf ogt, %87, %88 : vector<16x128xf32>
    %90 = arith.extui %89 : vector<16x128xi1> to vector<16x128xi32>
    %91 = arith.sitofp %90 : vector<16x128xi32> to vector<16x128xf32>
    %cst_39 = arith.constant 0.899999976 : f32
    %92 = vector.broadcast %cst_39 : f32 to vector<16x128xf32>
    %93 = arith.mulf %92, %46 : vector<16x128xf32>
    %94 = arith.addf %93, %91 : vector<16x128xf32>
    %95 = arith.addf %47, %91 : vector<16x128xf32>
    %96 = arith.extui %89 : vector<16x128xi1> to vector<16x128xi32>
    %97 = arith.sitofp %96 : vector<16x128xi32> to vector<16x128xf32>
    %98 = arith.truncf %97 : vector<16x128xf32> to vector<16x128xbf16>
    %cst_40 = arith.constant dense<0.000000e+00> : vector<16x256xf32>
    %99 = tpu.matmul %98, %7, %cst_40 {dimension_numbers = #tpu.dot_dimension_numbers<[1], [0], [0], [1], [0, 0, 1, 1], [], []>} : vector<16x128xbf16>, vector<128x256xbf16>, vector<16x256xf32> -> vector<16x256xf32>
    %100 = vector.extract_strided_slice %99 {offsets = [0, 0], sizes = [16, 128], strides = [1, 1]} : vector<16x256xf32> to vector<16x128xf32>
    %101 = vector.extract_strided_slice %99 {offsets = [0, 128], sizes = [16, 128], strides = [1, 1]} : vector<16x256xf32> to vector<16x128xf32>
    %102 = vector.broadcast %5 : vector<1x128xf32> to vector<16x128xf32>
    %103 = arith.mulf %102, %58 : vector<16x128xf32>
    %104 = vector.broadcast %6 : vector<1x128xf32> to vector<16x128xf32>
    %105 = arith.mulf %104, %101 : vector<16x128xf32>
    %106 = arith.addf %103, %105 : vector<16x128xf32>
    %107 = arith.index_cast %c1_i32 : i32 to index
    %c0_41 = arith.constant 0 : index
    %c0_42 = arith.constant 0 : index
    %108 = vector.load %arg8[%107, %c0_41, %c0_42] : memref<4x16x128xf32, #tpu.memory_space<vmem>>, vector<1x16x128xf32>
    %109 = vector.shape_cast %108 : vector<1x16x128xf32> to vector<16x128xf32>
    %110 = vector.shape_cast %106 : vector<16x128xf32> to vector<1x16x128xf32>
    tpu.vector_store %arg8[%107, %c0_41, %c0_42], %110 {strides = array<i32>} : memref<4x16x128xf32, #tpu.memory_space<vmem>>, vector<1x16x128xf32>,
    %c2_i32 = arith.constant 2 : i32
    %111 = arith.index_cast %c2_i32 : i32 to index
    %c0_43 = arith.constant 0 : index
    %c0_44 = arith.constant 0 : index
    %112 = vector.load %arg2[%111, %c0_43, %c0_44] : memref<4x16x128xbf16, #tpu.memory_space<vmem>>, vector<1x16x128xbf16>
    %113 = vector.shape_cast %112 : vector<1x16x128xbf16> to vector<16x128xbf16>
    %114 = arith.extf %113 : vector<16x128xbf16> to vector<16x128xf32>
    %115 = arith.addf %114, %100 : vector<16x128xf32>
    %116 = vector.broadcast %4 : vector<1x128xf32> to vector<16x128xf32>
    %117 = arith.subf %116, %94 : vector<16x128xf32>
    %118 = arith.mulf %117, %77 : vector<16x128xf32>
    %119 = vector.broadcast %3 : vector<1x128xf32> to vector<16x128xf32>
    %120 = arith.mulf %119, %84 : vector<16x128xf32>
    %121 = arith.subf %118, %120 : vector<16x128xf32>
    %122 = arith.addf %121, %115 : vector<16x128xf32>
    %cst_45 = arith.constant 0.00999999977 : f32
    %123 = vector.broadcast %cst_45 : f32 to vector<16x128xf32>
    %124 = arith.mulf %123, %122 : vector<16x128xf32>
    %125 = arith.addf %77, %124 : vector<16x128xf32>
    %126 = vector.broadcast %3 : vector<1x128xf32> to vector<16x128xf32>
    %127 = arith.mulf %126, %77 : vector<16x128xf32>
    %128 = arith.mulf %117, %84 : vector<16x128xf32>
    %129 = arith.addf %127, %128 : vector<16x128xf32>
    %cst_46 = arith.constant 0.00999999977 : f32
    %130 = vector.broadcast %cst_46 : f32 to vector<16x128xf32>
    %131 = arith.mulf %130, %129 : vector<16x128xf32>
    %132 = arith.addf %84, %131 : vector<16x128xf32>
    %cst_47 = arith.constant 1.000000e+00 : f32
    %133 = vector.broadcast %cst_47 : f32 to vector<16x128xf32>
    %134 = arith.addf %133, %94 : vector<16x128xf32>
    %135 = arith.subf %125, %134 : vector<16x128xf32>
    %cst_48 = arith.constant 0.000000e+00 : f32
    %136 = vector.broadcast %cst_48 : f32 to vector<16x128xf32>
    %137 = arith.cmpf ogt, %135, %136 : vector<16x128xf32>
    %138 = arith.extui %137 : vector<16x128xi1> to vector<16x128xi32>
    %139 = arith.sitofp %138 : vector<16x128xi32> to vector<16x128xf32>
    %cst_49 = arith.constant 0.899999976 : f32
    %140 = vector.broadcast %cst_49 : f32 to vector<16x128xf32>
    %141 = arith.mulf %140, %94 : vector<16x128xf32>
    %142 = arith.addf %141, %139 : vector<16x128xf32>
    %143 = arith.addf %95, %139 : vector<16x128xf32>
    %144 = arith.extui %137 : vector<16x128xi1> to vector<16x128xi32>
    %145 = arith.sitofp %144 : vector<16x128xi32> to vector<16x128xf32>
    %146 = arith.truncf %145 : vector<16x128xf32> to vector<16x128xbf16>
    %cst_50 = arith.constant dense<0.000000e+00> : vector<16x256xf32>
    %147 = tpu.matmul %146, %7, %cst_50 {dimension_numbers = #tpu.dot_dimension_numbers<[1], [0], [0], [1], [0, 0, 1, 1], [], []>} : vector<16x128xbf16>, vector<128x256xbf16>, vector<16x256xf32> -> vector<16x256xf32>
    %148 = vector.extract_strided_slice %147 {offsets = [0, 0], sizes = [16, 128], strides = [1, 1]} : vector<16x256xf32> to vector<16x128xf32>
    %149 = vector.extract_strided_slice %147 {offsets = [0, 128], sizes = [16, 128], strides = [1, 1]} : vector<16x256xf32> to vector<16x128xf32>
    %150 = vector.broadcast %5 : vector<1x128xf32> to vector<16x128xf32>
    %151 = arith.mulf %150, %106 : vector<16x128xf32>
    %152 = vector.broadcast %6 : vector<1x128xf32> to vector<16x128xf32>
    %153 = arith.mulf %152, %149 : vector<16x128xf32>
    %154 = arith.addf %151, %153 : vector<16x128xf32>
    %155 = arith.index_cast %c2_i32 : i32 to index
    %c0_51 = arith.constant 0 : index
    %c0_52 = arith.constant 0 : index
    %156 = vector.load %arg8[%155, %c0_51, %c0_52] : memref<4x16x128xf32, #tpu.memory_space<vmem>>, vector<1x16x128xf32>
    %157 = vector.shape_cast %156 : vector<1x16x128xf32> to vector<16x128xf32>
    %158 = vector.shape_cast %154 : vector<16x128xf32> to vector<1x16x128xf32>
    tpu.vector_store %arg8[%155, %c0_51, %c0_52], %158 {strides = array<i32>} : memref<4x16x128xf32, #tpu.memory_space<vmem>>, vector<1x16x128xf32>,
    %c3_i32 = arith.constant 3 : i32
    %159 = arith.index_cast %c3_i32 : i32 to index
    %c0_53 = arith.constant 0 : index
    %c0_54 = arith.constant 0 : index
    %160 = vector.load %arg2[%159, %c0_53, %c0_54] : memref<4x16x128xbf16, #tpu.memory_space<vmem>>, vector<1x16x128xbf16>
    %161 = vector.shape_cast %160 : vector<1x16x128xbf16> to vector<16x128xbf16>
    %162 = arith.extf %161 : vector<16x128xbf16> to vector<16x128xf32>
    %163 = arith.addf %162, %148 : vector<16x128xf32>
    %164 = vector.broadcast %4 : vector<1x128xf32> to vector<16x128xf32>
    %165 = arith.subf %164, %142 : vector<16x128xf32>
    %166 = arith.mulf %165, %125 : vector<16x128xf32>
    %167 = vector.broadcast %3 : vector<1x128xf32> to vector<16x128xf32>
    %168 = arith.mulf %167, %132 : vector<16x128xf32>
    %169 = arith.subf %166, %168 : vector<16x128xf32>
    %170 = arith.addf %169, %163 : vector<16x128xf32>
    %cst_55 = arith.constant 0.00999999977 : f32
    %171 = vector.broadcast %cst_55 : f32 to vector<16x128xf32>
    %172 = arith.mulf %171, %170 : vector<16x128xf32>
    %173 = arith.addf %125, %172 : vector<16x128xf32>
    %174 = vector.broadcast %3 : vector<1x128xf32> to vector<16x128xf32>
    %175 = arith.mulf %174, %125 : vector<16x128xf32>
    %176 = arith.mulf %165, %132 : vector<16x128xf32>
    %177 = arith.addf %175, %176 : vector<16x128xf32>
    %cst_56 = arith.constant 0.00999999977 : f32
    %178 = vector.broadcast %cst_56 : f32 to vector<16x128xf32>
    %179 = arith.mulf %178, %177 : vector<16x128xf32>
    %180 = arith.addf %132, %179 : vector<16x128xf32>
    %cst_57 = arith.constant 1.000000e+00 : f32
    %181 = vector.broadcast %cst_57 : f32 to vector<16x128xf32>
    %182 = arith.addf %181, %142 : vector<16x128xf32>
    %183 = arith.subf %173, %182 : vector<16x128xf32>
    %cst_58 = arith.constant 0.000000e+00 : f32
    %184 = vector.broadcast %cst_58 : f32 to vector<16x128xf32>
    %185 = arith.cmpf ogt, %183, %184 : vector<16x128xf32>
    %186 = arith.extui %185 : vector<16x128xi1> to vector<16x128xi32>
    %187 = arith.sitofp %186 : vector<16x128xi32> to vector<16x128xf32>
    %cst_59 = arith.constant 0.899999976 : f32
    %188 = vector.broadcast %cst_59 : f32 to vector<16x128xf32>
    %189 = arith.mulf %188, %142 : vector<16x128xf32>
    %190 = arith.addf %189, %187 : vector<16x128xf32>
    %191 = arith.addf %143, %187 : vector<16x128xf32>
    %192 = arith.extui %185 : vector<16x128xi1> to vector<16x128xi32>
    %193 = arith.sitofp %192 : vector<16x128xi32> to vector<16x128xf32>
    %194 = arith.truncf %193 : vector<16x128xf32> to vector<16x128xbf16>
    %cst_60 = arith.constant dense<0.000000e+00> : vector<16x256xf32>
    %195 = tpu.matmul %194, %7, %cst_60 {dimension_numbers = #tpu.dot_dimension_numbers<[1], [0], [0], [1], [0, 0, 1, 1], [], []>} : vector<16x128xbf16>, vector<128x256xbf16>, vector<16x256xf32> -> vector<16x256xf32>
    %196 = vector.extract_strided_slice %195 {offsets = [0, 0], sizes = [16, 128], strides = [1, 1]} : vector<16x256xf32> to vector<16x128xf32>
    %197 = vector.extract_strided_slice %195 {offsets = [0, 128], sizes = [16, 128], strides = [1, 1]} : vector<16x256xf32> to vector<16x128xf32>
    %198 = vector.broadcast %5 : vector<1x128xf32> to vector<16x128xf32>
    %199 = arith.mulf %198, %154 : vector<16x128xf32>
    %200 = vector.broadcast %6 : vector<1x128xf32> to vector<16x128xf32>
    %201 = arith.mulf %200, %197 : vector<16x128xf32>
    %202 = arith.addf %199, %201 : vector<16x128xf32>
    %203 = arith.index_cast %c3_i32 : i32 to index
    %c0_61 = arith.constant 0 : index
    %c0_62 = arith.constant 0 : index
    %204 = vector.load %arg8[%203, %c0_61, %c0_62] : memref<4x16x128xf32, #tpu.memory_space<vmem>>, vector<1x16x128xf32>
    %205 = vector.shape_cast %204 : vector<1x16x128xf32> to vector<16x128xf32>
    %206 = vector.shape_cast %202 : vector<16x128xf32> to vector<1x16x128xf32>
    tpu.vector_store %arg8[%203, %c0_61, %c0_62], %206 {strides = array<i32>} : memref<4x16x128xf32, #tpu.memory_space<vmem>>, vector<1x16x128xf32>,
    %c4_i32 = arith.constant 4 : i32
    %c0_63 = arith.constant 0 : index
    %c0_64 = arith.constant 0 : index
    %207 = vector.load %arg9[%c0_63, %c0_64] : memref<16x128xf32, #tpu.memory_space<vmem>>, vector<16x128xf32>
    tpu.vector_store %arg9[%c0_63, %c0_64], %187 {strides = array<i32>} : memref<16x128xf32, #tpu.memory_space<vmem>>, vector<16x128xf32>,
    %c0_65 = arith.constant 0 : index
    %c0_66 = arith.constant 0 : index
    %208 = vector.load %arg10[%c0_65, %c0_66] : memref<16x128xf32, #tpu.memory_space<vmem>>, vector<16x128xf32>
    tpu.vector_store %arg10[%c0_65, %c0_66], %173 {strides = array<i32>} : memref<16x128xf32, #tpu.memory_space<vmem>>, vector<16x128xf32>,
    %c0_67 = arith.constant 0 : index
    %c0_68 = arith.constant 0 : index
    %209 = vector.load %arg11[%c0_67, %c0_68] : memref<16x128xf32, #tpu.memory_space<vmem>>, vector<16x128xf32>
    tpu.vector_store %arg11[%c0_67, %c0_68], %202 {strides = array<i32>} : memref<16x128xf32, #tpu.memory_space<vmem>>, vector<16x128xf32>,
    %c0_69 = arith.constant 0 : index
    %c0_70 = arith.constant 0 : index
    %210 = vector.load %arg13[%c0_69, %c0_70] : memref<16x128xf32, #tpu.memory_space<vmem>>, vector<16x128xf32>
    tpu.vector_store %arg13[%c0_69, %c0_70], %180 {strides = array<i32>} : memref<16x128xf32, #tpu.memory_space<vmem>>, vector<16x128xf32>,
    %c0_71 = arith.constant 0 : index
    %c0_72 = arith.constant 0 : index
    %211 = vector.load %arg14[%c0_71, %c0_72] : memref<16x128xf32, #tpu.memory_space<vmem>>, vector<16x128xf32>
    tpu.vector_store %arg14[%c0_71, %c0_72], %190 {strides = array<i32>} : memref<16x128xf32, #tpu.memory_space<vmem>>, vector<16x128xf32>,
    %c0_73 = arith.constant 0 : index
    %c0_74 = arith.constant 0 : index
    %212 = vector.load %arg16[%c0_73, %c0_74] : memref<16x128xf32, #tpu.memory_space<vmem>>, vector<16x128xf32>
    tpu.vector_store %arg16[%c0_73, %c0_74], %196 {strides = array<i32>} : memref<16x128xf32, #tpu.memory_space<vmem>>, vector<16x128xf32>,
    %c0_75 = arith.constant 0 : index
    %c0_76 = arith.constant 0 : index
    %213 = vector.load %arg15[%c0_75, %c0_76] : memref<16x128xf32, #tpu.memory_space<vmem>>, vector<16x128xf32>
    %214 = arith.addf %213, %191 : vector<16x128xf32>
    %c0_77 = arith.constant 0 : index
    %c0_78 = arith.constant 0 : index
    %215 = vector.load %arg15[%c0_77, %c0_78] : memref<16x128xf32, #tpu.memory_space<vmem>>, vector<16x128xf32>
    tpu.vector_store %arg15[%c0_77, %c0_78], %214 {strides = array<i32>} : memref<16x128xf32, #tpu.memory_space<vmem>>, vector<16x128xf32>,
    %c1_i32_79 = arith.constant 1 : i32
    %216 = arith.cmpi eq, %arg1, %c1_i32_79 : i32
    %217 = arith.extui %216 : i1 to i32
    %c0_i32_80 = arith.constant 0 : i32
    %218 = arith.cmpi ne, %217, %c0_i32_80 : i32
    scf.if %218 {
      %219 = vector.shape_cast %214 : vector<16x128xf32> to vector<1x16x128xf32>
      %cst_81 = arith.constant dense<0.000000e+00> : vector<1xf32>
      %220 = vector.multi_reduction <add>, %219, %cst_81 [1, 2] : vector<1x16x128xf32> to vector<1xf32>
      %221 = vector.shape_cast %220 : vector<1xf32> to vector<1x1x1xf32>
      %222 = vector.extract %221[0, 0, 0] : f32 from vector<1x1x1xf32>
      %223 = vector.broadcast %222 : f32 to vector<1x1xf32>
      %c0_82 = arith.constant 0 : index
      %c0_83 = arith.constant 0 : index
      %c0_84 = arith.constant 0 : index
      %224 = vector.load %arg12[%c0_82, %c0_83, %c0_84] : memref<1x1x1xf32, #tpu.memory_space<vmem>>, vector<1x1x1xf32>
      %225 = vector.shape_cast %224 : vector<1x1x1xf32> to vector<1x1xf32>
      %226 = vector.shape_cast %223 : vector<1x1xf32> to vector<1x1x1xf32>
      tpu.vector_store %arg12[%c0_82, %c0_83, %c0_84], %226 {strides = array<i32>} : memref<1x1x1xf32, #tpu.memory_space<vmem>>, vector<1x1x1xf32>,
    } else {
    }
    return
  }
  func.func @transform_0(%arg0: i32, %arg1: i32) -> (i32, i32, i32) {
    %c0_i32 = arith.constant 0 : i32
    %c0_i32_0 = arith.constant 0 : i32
    return %arg1, %arg0, %c0_i32 : i32, i32, i32
  }
  func.func @transform_1(%arg0: i32, %arg1: i32) -> (i32, i32) {
    %c0_i32 = arith.constant 0 : i32
    %c0_i32_0 = arith.constant 0 : i32
    %c0_i32_1 = arith.constant 0 : i32
    return %c0_i32, %c0_i32_0 : i32, i32
  }
  func.func @transform_2(%arg0: i32, %arg1: i32) -> (i32, i32) {
    %c0_i32 = arith.constant 0 : i32
    %c0_i32_0 = arith.constant 0 : i32
    %c0_i32_1 = arith.constant 0 : i32
    return %c0_i32, %c0_i32_0 : i32, i32
  }
  func.func @transform_3(%arg0: i32, %arg1: i32) -> (i32, i32) {
    %c0_i32 = arith.constant 0 : i32
    %c0_i32_0 = arith.constant 0 : i32
    %c0_i32_1 = arith.constant 0 : i32
    return %c0_i32, %c0_i32_0 : i32, i32
  }
  func.func @transform_4(%arg0: i32, %arg1: i32) -> (i32, i32) {
    %c0_i32 = arith.constant 0 : i32
    %c0_i32_0 = arith.constant 0 : i32
    %c0_i32_1 = arith.constant 0 : i32
    return %c0_i32, %c0_i32_0 : i32, i32
  }
  func.func @transform_5(%arg0: i32, %arg1: i32) -> (i32, i32) {
    %c0_i32 = arith.constant 0 : i32
    %c0_i32_0 = arith.constant 0 : i32
    %c0_i32_1 = arith.constant 0 : i32
    return %c0_i32, %c0_i32_0 : i32, i32
  }
  func.func @transform_6(%arg0: i32, %arg1: i32) -> (i32, i32, i32) {
    %c0_i32 = arith.constant 0 : i32
    %c0_i32_0 = arith.constant 0 : i32
    return %arg1, %arg0, %c0_i32 : i32, i32, i32
  }
  func.func @transform_7(%arg0: i32, %arg1: i32) -> (i32, i32) {
    %c0_i32 = arith.constant 0 : i32
    %c0_i32_0 = arith.constant 0 : i32
    return %arg0, %c0_i32 : i32, i32
  }
  func.func @transform_8(%arg0: i32, %arg1: i32) -> (i32, i32) {
    %c0_i32 = arith.constant 0 : i32
    %c0_i32_0 = arith.constant 0 : i32
    return %arg0, %c0_i32 : i32, i32
  }
  func.func @transform_9(%arg0: i32, %arg1: i32) -> (i32, i32) {
    %c0_i32 = arith.constant 0 : i32
    %c0_i32_0 = arith.constant 0 : i32
    return %arg0, %c0_i32 : i32, i32
  }
  func.func @transform_10(%arg0: i32, %arg1: i32) -> (i32, i32, i32) {
    %c0_i32 = arith.constant 0 : i32
    %c0_i32_0 = arith.constant 0 : i32
    %c0_i32_1 = arith.constant 0 : i32
    return %arg0, %c0_i32, %c0_i32_0 : i32, i32, i32
  }
}

</mosaic_0001>

<bundles_post_ra>
// kernel: tpu_custom_call.1
= control target key start
LH: loop header
LB: loop body
LE: loop exit
PB: predicated region body
PF: predicated region fallthrough
CT: control target
= control target key end

     0   :  { %s2460_s0 = inlined_call_operand.hbm [shape: bf16[8,16,128], index: 0, kind: input, shape index: {}]   ;;  %s2461_s1 = inlined_call_operand.hbm [shape: bf16[128,256], index: 1, kind: input, shape index: {}]   ;;  %s2462_s2 = inlined_call_operand.vmem [shape: f32[1,128], index: 2, kind: input, shape index: {}]   ;;  %s2463_s3 = inlined_call_operand.vmem [shape: f32[1,128], index: 3, kind: input, shape index: {}]   ;;  %s2464_s4 = inlined_call_operand.vmem [shape: f32[1,128], index: 4, kind: input, shape index: {}]   ;;  %s2465_s5 = inlined_call_operand.vmem [shape: f32[1,128], index: 5, kind: input, shape index: {}]   ;;  %s2466_s6 = inlined_call_operand.hbm [shape: f32[8,16,128], index: 6, kind: output, shape index: {0}]   ;;  %s2467_s7 = inlined_call_operand.hbm [shape: f32[16,128], index: 7, kind: output, shape index: {1}]   ;;  %s2468_s8 = inlined_call_operand.hbm [shape: f32[16,128], index: 8, kind: output, shape index: {2}]   ;;  %s2469_s9 = inlined_call_operand.hbm [shape: f32[16,128], index: 9, kind: output, shape index: {3}]   ;;  %s2470_s10 = inlined_call_operand.hbm [shape: f32[1,1,1], index: 10, kind: output, shape index: {4}]  }
   0x1   :  { %2480 = sst [smem:[#allocation25_spill]] %s2461_s1 }
   0x2   :  { %2481 = sst [smem:[#allocation26_spill]] %s2468_s8 }
   0x3   :  { %2482 = sst [smem:[#allocation27_spill]] %s2470_s10 }
   0x4   :  { %16 = vsyncpa [#allocation7], 0 }
   0x5   :  { %18 = vsyncpa [#allocation7 + $0x1], 0 }
   0x6   :  { %19 = vsyncpa [#allocation10], 0 }
   0x7   :  { %20 = vsyncpa [#allocation8], 0 }
   0x8   :  { %22 = vsyncpa [#allocation8 + $0x1], 0 }
   0x9   :  { %23 = vsyncpa [#allocation13], 0 }
   0xa   :  { %24 = vsyncpa [#allocation16], 0  ;;  %s1808_s13 = smov 0   ;;  %s1810_s14 = smov 0  }
   0xb   :  { %s1812_s15 = smov 0   ;;  %s1814_s16 = smov 0  }
   0xc   :  { %s1816_s17 = smov 0   ;;  %s1818_s18 = smov 0  }
   0xd LB: > { %2483 = sst [smem:[#allocation23_spill]] %s1714_s13  ;;  %s1241_s19 = sadd.s32 4294967295, %s1734_s18   ;;  %s1734_s18 = sphi %s1818_s18, %s30_s18   ;;  %s1730_s17 = sphi %s1816_s17, %s2514_s17   ;;  %s1726_s16 = sphi %s1814_s16, %s2513_s16   ;;  %s1722_s15 = sphi %s1812_s15, %s2512_s15   ;;  %s1718_s14 = sphi %s1810_s14, %s2511_s14   ;;  %s1714_s13 = sphi %s1808_s13, %s2510_s13  }
   0xe   : > { %s1242_s20 = sadd.s32 4294967294, %s1734_s18   ;;  %p64_p0 = scmp.ne.s32.totalorder %s1718_s14, %s1714_s13 }
   0xf   : > { %p1842_p1 = scmp.eq.s32.totalorder %s1241_s19, 0  ;;  %p1846_p2 = scmp.eq.s32.totalorder %s1241_s19, 1 }
  0x10   : > { %p201_p3 = scmp.eq.s32.totalorder %s1242_s20, 1  ;;  %p1243_p5 = scmp.ge.s32.totalorder %s1734_s18, 1 }
  0x11   : > { %s2484_s21 = scalar_select %p1842_p1, 1, 0 }
  0x12   : > { %s2485_s22 = scalar_select %p1846_p2, 1, 0 }
  0x13   : > { %p1852_p4 = por %p1842_p1, %p64_p0  ;;  %p1857_p6 = por %p201_p3, %p64_p0 }
  0x14   : > { %p312_p7 = scmp.lt.s32.totalorder %s1734_s18, 3  ;;  %s1736_s26 = smov [#allocation9]  }
  0x15   : > { %s2486_s23 = scalar_select %p1852_p4, 1, 0 }
  0x16   : > { %s2487_s24 = scalar_select %p1857_p6, 1, 0 }
  0x17   : > { %p1862_p8 = pnand %p1243_p5, %p312_p7  ;;  %s324_s27 = sshll.u32 %s1736_s26, 4  ;;  %s325_s27 = int_to_ptr.vmem [resolvable:$true] %s324_s27 }
  0x18   : > { %2488 = sst [smem:[#allocation24_spill]] %s2487_s24  ;;  %s39_s29 = sadd.s32 1, %s1730_s17 }
  0x19   : > { %s2489_s25 = scalar_select %p1862_p8, 1, 0 }
  0x1a   : > { %p1367_p9 = pneg %p1862_p8  ;;  %s2491_s1 = sld [smem:[#allocation25_spill]] }
  0x1c   : > { %p1871_p11 = pnand %p1367_p9, %p1842_p1 }
  0x1e   : > { %p1480_p13 = pneg %p1871_p11 }
  0x20   : > { %s1478_s12 = scalar_lea.hbm %s2491_s1, 2048 }
  0x21   : > { %p1479_p12 = scmp.ne.s32.totalorder %s2491_s1, %s1478_s12  ;;  %p1485_p5 = scmp.lt.u32.totalorder %s1478_s12, %s2491_s1 }
  0x23   : > { %p1481_p0 = pnand %p1480_p13, %p1479_p12 }
  0x25   : > { %p1482_p3 = pneg %p1481_p0 }
  0x27   : > { %p1487_p7 = pnand %p1485_p5, %p1482_p3 }
  0x29   : > { %1490 = shalt.err (!%p1487_p7)
}
  0x2a   : > { %s1491_s13 = scalar_lea.vmem %s325_s27, 2048  ;;  %p1499_p1 = scmp.lt.s32.totalorder %s325_s27, %s325_s27 }
  0x2b   : > { %p1492_p9 = scmp.ne.s32.totalorder %s325_s27, %s1491_s13  ;;  %p1500_p4 = scmp.lt.s32.totalorder %s1491_s13, %s1491_s13 }
  0x2d   : > { %p1494_p10 = pnand %p1492_p9, %p1480_p13  ;;  %p1501_p8 = por %p1500_p4, %p1499_p1 }
  0x2f   : > { %p1495_p6 = pneg %p1494_p10 }
  0x31   : > { %p1502_p2 = pnand %p1501_p8, %p1495_p6 }
  0x33   : > { %1505 = shalt.err (!%p1502_p2)
}
  0x34   : > { %s1737_s30 = smov 128   ;;  %s1738_s24 = smov 8  }
  0x35   : > { %1370 = dma.hbm_to_vmem [thread:$0]  (!%p1871_p11), %s2491_s1, 2048, %s325_s27, [#allocation10], %s1737_s30, %s1737_s30, %s1738_s24  }
  0x36   : > { %p40_p1 = scmp.ge.s32.totalorder %s39_s29, 2  ;;  %s51_s13 = sadd.s32 1, %s1722_s15 }
  0x37   : > { %p58_p2 = scmp.ne.s32.totalorder %s1722_s15, %s1718_s14  ;;  %p59_p4 = scmp.eq.s32.totalorder %s1734_s18, 0 }
  0x38   : > { %s2516_s29 = smov (%p40_p1, %s39_s29), 0  ;;  %p2493_p8 = scmp.ne.s32.totalorder %s2485_s22, 0 }
  0x39   : > { %p1898_p6 = por %p59_p4, %p58_p2  ;;  %s46_s28 = ssub.s32 %s1730_s17, %s2516_s29 }
  0x3a   : > { %p1904_p10 = por %p2493_p8, %p58_p2  ;;  %p1380_p12 = scmp.lt.s32.totalorder %s1734_s18, 2 }
  0x3b   : > { %p49_p11 = scmp.eq.s32.totalorder %s46_s28, 0  ;;  %s350_s27 = sand.u32 1, %s1722_s15  }
  0x3c   : > { %s1246_s26 = sshll.u32 %s350_s27, 5  ;;  %s1319_s24 = sshll.u32 %s1730_s17, 9 }
  0x3d   : > { %s1913_s30 = scalar_select %p49_p11, %s1722_s15, %s51_s13  }
  0x3e   : > { %s1919_s1 = scalar_lea.hbm %s2460_s0, %s1319_s24  ;;  %s354_s10 = scalar_lea.vmem [#allocation6], %s1246_s26 }
  0x3f   : > { %s364_s8 = sshll.u32 %s354_s10, 4  ;;  %p1925_p13 = pnand %p1380_p12, %p1898_p6  ;;  %s1921_s8 = int_to_ptr.vmem [resolvable:$true] %s364_s8 }
  0x40   : > { %s1929_s13 = scalar_lea.sflag [#allocation7], %s350_s27  ;;  %s1506_s11 = scalar_lea.hbm %s1919_s1, 512 }
  0x41   : > { %p1507_p0 = scmp.ne.s32.totalorder %s1919_s1, %s1506_s11  ;;  %p1508_p3 = pneg %p1925_p13 }
  0x42   : > { %s1511_s19 = scalar_lea.hbm %s2460_s0, 1024  ;;  %p1512_p9 = scmp.lt.u32.totalorder %s1919_s1, %s2460_s0 }
  0x43   : > { %p1509_p5 = pnand %p1508_p3, %p1507_p0  ;;  %p1513_p1 = scmp.lt.u32.totalorder %s1511_s19, %s1506_s11 }
  0x44   : > { %p1515_p4 = scmp.lt.u32.totalorder %s1506_s11, %s1919_s1 }
  0x45   : > { %p1510_p7 = pneg %p1509_p5  ;;  %p1514_p2 = por %p1513_p1, %p1512_p9 }
  0x47   : > { %p1516_p6 = por %p1515_p4, %p1514_p2 }
  0x49   : > { %p1517_p8 = pnand %p1516_p6, %p1510_p7 }
  0x4b   : > { %1520 = shalt.err (!%p1517_p8)
}
  0x4c   : > { %s1521_s27 = scalar_lea.vmem %s1921_s8, 512  ;;  %s1739_s10 = smov [#allocation6]  }
  0x4d   : > { %p1522_p12 = scmp.ne.s32.totalorder %s1921_s8, %s1521_s27  ;;  %s1526_s26 = sshll.u32 %s1739_s10, 4  ;;  %s1527_s26 = int_to_ptr.vmem [resolvable:$false] %s1526_s26 }
  0x4e   : > { %s1528_s24 = scalar_lea.vmem %s1527_s26, 1024  ;;  %p1529_p5 = scmp.lt.s32.totalorder %s1921_s8, %s1527_s26 }
  0x4f   : > { %p1524_p11 = pnand %p1522_p12, %p1508_p3  ;;  %p1530_p9 = scmp.lt.s32.totalorder %s1528_s24, %s1521_s27 }
  0x51   : > { %p1525_p0 = pneg %p1524_p11  ;;  %p1531_p1 = por %p1530_p9, %p1529_p5 }
  0x53   : > { %p1532_p2 = pnand %p1531_p1, %p1525_p0 }
  0x55   : > { %1535 = shalt.err (!%p1532_p2)
}
  0x56   : > { %s1740_s11 = smov 64   ;;  %s1741_s19 = smov 4  }
  0x57   : > { %1374 = dma.hbm_to_vmem [thread:$0]  (!%p1925_p13), %s1919_s1, 512, %s1921_s8, %s1929_s13, %s1740_s11, %s1740_s11, %s1741_s19  }
  0x58   : > { %p2496_p3 = scmp.ne.s32.totalorder %s2489_s25, 0 }
  0x59   : > { %s1960_s12 = sand.u32 (!%p2496_p3), 1, %s1718_s14   ;;  %p2497_p7 = scmp.ne.s32.totalorder (!%p2496_p3), %s2486_s23, 0 }
  0x5a   : > { %376 = sbr.rel (%p2496_p3) target bundleno = 1171 (0x493), region = 44  ;;  %s1251_s27 = sshll.u32 (!%p2496_p3), %s1960_s12, 5 }
  0x5b   : > { %s379_s10 = scalar_lea.sflag (!%p2496_p3), [#allocation7], %s1960_s12  ;;  %s1964_s26 = scalar_lea.vmem (!%p2496_p3), [#allocation6], %s1251_s27 }
  0x61   : > { %1693 = dma.done.wait (%p2497_p7), %s379_s10, 512  }
  0x62   : > { %1695 = vsyncadd (%p2497_p7), %s379_s10, 4294966784  ;;  %p2498_p13 = scmp.ne.s32.totalorder %s2484_s21, 0 }
  0x64   : > { %1697 = dma.done.wait (%p2498_p13), [#allocation10], 2048  }
  0x65   : > { %1699 = vsyncadd (%p2498_p13), [#allocation10], 4294965248  ;;  %s1253_s1 = sshll.u32 %s1960_s12, 6  ;;  %p1254_p4 = scmp.ne.s32.totalorder %s1726_s16, 0 }
  0x66   : > { %s1975_s8 = scalar_lea.vmem [#allocation11], %s1253_s1  ;;  %v1742_v0 = vmov (!%p1254_p4), 0.0  }
  0x67   : > { %434 = sbr.rel (%p1254_p4) target bundleno = 110 (0x6e), region = 56  ;;  %435 = vst [vmem:[#allocation12] sm:$0xff] (!%p1254_p4), %v1742_v0  ;;  %436 = vst [vmem:[#allocation12 + $0x8] sm:$0xff] (!%p1254_p4), %v1742_v0 }
  0x68   : > { %437 = vst [vmem:[#allocation14] sm:$0xff] (!%p1254_p4), %v1742_v0  ;;  %438 = vst [vmem:[#allocation14 + $0x8] sm:$0xff] (!%p1254_p4), %v1742_v0 }
  0x69   : > { %439 = vst [vmem:[#allocation15] sm:$0xff] (!%p1254_p4), %v1742_v0  ;;  %440 = vst [vmem:[#allocation15 + $0x8] sm:$0xff] (!%p1254_p4), %v1742_v0 }
  0x6a   : > { %441 = vst [vmem:[#allocation2] sm:$0xff] (!%p1254_p4), %v1742_v0  ;;  %442 = vst [vmem:[#allocation2 + $0x8] sm:$0xff] (!%p1254_p4), %v1742_v0 }
  0x6b   : > { %443 = vst [vmem:[#allocation3] sm:$0xff] (!%p1254_p4), %v1742_v0  ;;  %444 = vst [vmem:[#allocation3 + $0x8] sm:$0xff] (!%p1254_p4), %v1742_v0 }
  0x6c   : > { %445 = vst [vmem:[#allocation4] sm:$0xff] (!%p1254_p4), %v1742_v0  ;;  %446 = vst [vmem:[#allocation4 + $0x8] sm:$0xff] (!%p1254_p4), %v1742_v0 }
  0x6d   : > { %447 = vst [vmem:[#allocation5] sm:$0xff] (!%p1254_p4), %v1742_v0  ;;  %448 = vst [vmem:[#allocation5 + $0x8] sm:$0xff] (!%p1254_p4), %v1742_v0 }
  0x6e PF: > { %v1978_v1 = vld [vmem:[#allocation9 + $0x4] ss:$8 sps:$4 sm:$0xff]   ;;  %v1980_v2 = vld [vmem:[#allocation9] ss:$8 sps:$4 sm:$0xff]   ;;  %v1743_v3 = vmov 0   ;;  %v1745_v60 = vmov 0.0  }
  0x6f   : > { %650 = vmatprep.mubr.bf16.mxu0 %v1743_v3  ;;  %761 = vmatprep.mubr.bf16.mxu1 %v1743_v3  ;;  %v1985_v4 = vld [vmem:[#allocation9 + $0x14] ss:$8 sps:$4 sm:$0xff]   ;;  %v1989_v5 = vld [vmem:[#allocation9 + $0x10] ss:$8 sps:$4 sm:$0xff]   ;;  %v1993_v6 = vld [vmem:[#allocation9 + $0x24] ss:$8 sps:$4 sm:$0xff]  }
  0x70   : > { %618 = vmatprep.subr.bf16.mxu0 %v1978_v1  ;;  %729 = vmatprep.subr.bf16.mxu1 %v1978_v1  ;;  %v1997_v7 = vld [vmem:[#allocation9 + $0x20] ss:$8 sps:$4 sm:$0xff]   ;;  %v2001_v8 = vld [vmem:[#allocation9 + $0x34] ss:$8 sps:$4 sm:$0xff]   ;;  %v2004_v9 = vld [vmem:[#allocation9 + $0x30] ss:$8 sps:$4 sm:$0xff]  }
  0x71   : > { %619 = vmatpush1.bf16.msra.mxu0 %v1980_v2  ;;  %730 = vmatpush1.bf16.msra.mxu1 %v1980_v2  ;;  %v2007_v10 = vld [vmem:[#allocation9 + $0x44] ss:$8 sps:$4 sm:$0xff]   ;;  %v2012_v11 = vld [vmem:[%s2462_s2] ss:$0 sm:$0xff]  ;;  %v2021_v13 = vld [vmem:[#allocation14] sm:$0xff]  ;;  %p1303_p6 = scmp.ne.s32.totalorder %s1726_s16, 1 }
  0x72   : > { %620 = vmatprep.subr.bf16.mxu0 %v1985_v4  ;;  %731 = vmatprep.subr.bf16.mxu1 %v1985_v4  ;;  %v2017_v12 = vld [vmem:[%s2463_s3] ss:$0 sm:$0xff]  ;;  %v2023_v14 = vld [vmem:[#allocation14 + $0x8] sm:$0xff]  ;;  %v2028_v16 = vld [vmem:[#allocation2 + $0x8] sm:$0xff]  ;;  %v1744_v53 = vmov 1.0|1.0   ;;  %v511_v54 = vmul.f32 %v2012_v11, %v2021_v13 }
  0x73   : > { %v2025_v15 = vld [vmem:[#allocation2] sm:$0xff]  ;;  %v2030_v17 = vld [vmem:[#allocation3] sm:$0xff]  ;;  %v2032_v18 = vld [vmem:[#allocation3 + $0x8] sm:$0xff]  ;;  %v502_v25 = vmul.f32 %v2012_v11, %v2028_v16  ;;  %v512_v56 = vmul.f32 %v2012_v11, %v2023_v14  ;;  %vm1014_vm12 = vcmask (!%p1303_p6), 0  }
  0x74   : > { %v469_v19 = vld [vmem:[#allocation5] sm:$0xff]  ;;  %v470_v20 = vld [vmem:[#allocation5 + $0x8] sm:$0xff]  ;;  %v1323_v21 = vld [vmem:[%s1964_s26] sm:$0xff]   ;;  %v2037_v22 = vsub.f32 %v2017_v12, %v2030_v17  ;;  %v2041_v23 = vsub.f32 %v2017_v12, %v2032_v18  ;;  %v501_v24 = vmul.f32 %v2012_v11, %v2025_v15  ;;  %v521_v42 = vadd.f32 1.0, %v2030_v17 }
  0x75   : > { %621 = vmatpush1.bf16.msra.mxu0 %v1989_v5  ;;  %732 = vmatpush1.bf16.msra.mxu1 %v1989_v5  ;;  %v2048_v26 = vld [vmem:[#allocation9 + $0x40] ss:$8 sps:$4 sm:$0xff]   ;;  %v1324_v27 = vunpack.c.l.bf16 %v1323_v21  ;;  %v1325_v28 = vunpack.c.h.bf16 %v1323_v21  ;;  %v2052_v29 = vld [vmem:[#allocation9 + $0x54] ss:$8 sps:$4 sm:$0xff]   ;;  %v2060_v36 = vld [vmem:[#allocation9 + $0x50] ss:$8 sps:$4 sm:$0xff]  }
  0x76   : > { %622 = vmatprep.subr.bf16.mxu0 %v1993_v6  ;;  %733 = vmatprep.subr.bf16.mxu1 %v1993_v6  ;;  %v493_v30 = vmul.f32 %v2037_v22, %v2021_v13  ;;  %v494_v31 = vmul.f32 %v2041_v23, %v2023_v14  ;;  %v2064_v37 = vld [vmem:[#allocation9 + $0x64] ss:$8 sps:$4 sm:$0xff]   ;;  %v522_v43 = vadd.f32 1.0, %v2032_v18  ;;  %v2070_v44 = vld [vmem:[#allocation9 + $0x60] ss:$8 sps:$4 sm:$0xff]   ;;  %v513_v55 = vmul.f32 %v2037_v22, %v2025_v15 }
  0x77   : > { %v483_v32 = vadd.f32 %v1324_v27, %v469_v19  ;;  %v484_v33 = vadd.f32 %v1325_v28, %v470_v20  ;;  %v2074_v45 = vld [vmem:[#allocation9 + $0x74] ss:$8 sps:$4 sm:$0xff]   ;;  %v2086_v50 = vld [vmem:[#allocation9 + $0x70] ss:$8 sps:$4 sm:$0xff]   ;;  %v514_v57 = vmul.f32 %v2041_v23, %v2028_v16  ;;  %v531_v58 = vmul.f32 0.9, %v2030_v17 }
  0x78   : > { %v503_v34 = vsub.f32 %v493_v30, %v501_v24  ;;  %v504_v35 = vsub.f32 %v494_v31, %v502_v25  ;;  %v515_v59 = vadd.f32 %v513_v55, %v511_v54  ;;  %v532_v62 = vmul.f32 0.9, %v2032_v18 }
  0x79   : > { %623 = vmatpush1.bf16.msra.mxu0 %v1997_v7  ;;  %734 = vmatpush1.bf16.msra.mxu1 %v1997_v7  ;;  %v516_v63 = vadd.f32 %v514_v57, %v512_v56 }
  0x7a   : > { %624 = vmatprep.subr.bf16.mxu0 %v2001_v8  ;;  %735 = vmatprep.subr.bf16.mxu1 %v2001_v8  ;;  %v505_v38 = vadd.f32 %v503_v34, %v483_v32  ;;  %v506_v39 = vadd.f32 %v504_v35, %v484_v33  ;;  %v1338_v33 = vld [vmem:[%s1964_s26 + $0x8] sm:$0xff]  }
  0x7b   : > { %v518_v17 = vmul.f32 0.01, %v516_v63 }
  0x7c   : > { %v507_v40 = vmul.f32 0.01, %v505_v38  ;;  %v508_v41 = vmul.f32 0.01, %v506_v39  ;;  %v2164_v38 = vld [vmem:[%s2464_s4] ss:$0 sm:$0xff] }
  0x7d   : > { %625 = vmatpush1.bf16.msra.mxu0 %v2004_v9  ;;  %736 = vmatpush1.bf16.msra.mxu1 %v2004_v9  ;;  %v520_v22 = vadd.f32 %v518_v17, %v2028_v16  ;;  %v1328_v16 = vunpack.c.l.bf16 %v1338_v33  ;;  %v477_v39 = vld [vmem:[#allocation15] sm:$0xff] }
  0x7e   : > { %626 = vmatprep.subr.bf16.mxu0 %v2007_v10  ;;  %737 = vmatprep.subr.bf16.mxu1 %v2007_v10  ;;  %v2077_v46 = vadd.f32 %v507_v40, %v2021_v13  ;;  %v2080_v47 = vadd.f32 %v508_v41, %v2023_v14  ;;  %v517_v13 = vmul.f32 0.01, %v515_v59  ;;  %v667_v52 = vmul.f32 %v2164_v38, %v477_v39 }
  0x7f   : > { %v693_v41 = vmul.f32 %v2012_v11, %v520_v22 }
  0x80   : > { %v523_v48 = vsub.f32 %v2077_v46, %v521_v42  ;;  %v524_v49 = vsub.f32 %v2080_v47, %v522_v43  ;;  %v519_v19 = vadd.f32 %v517_v13, %v2025_v15  ;;  %v702_v18 = vmul.f32 %v2012_v11, %v2077_v46  ;;  %v2171_v43 = vld [vmem:[%s2465_s5] ss:$0 sm:$0xff] }
  0x81   : > { %627 = vmatpush1.bf16.msra.mxu0 %v2048_v26  ;;  %738 = vmatpush1.bf16.msra.mxu1 %v2048_v26  ;;  %v703_v25 = vmul.f32 %v2012_v11, %v2080_v47 }
  0x82   : > { %628 = vmatprep.subr.bf16.mxu0 %v2052_v29  ;;  %739 = vmatprep.subr.bf16.mxu1 %v2052_v29  ;;  %vm2090_vm0 = vcmp.gt.f32.partialorder %v523_v48, 0.0  ;;  %vm2094_vm1 = vcmp.gt.f32.partialorder %v524_v49, 0.0  ;;  %v692_v35 = vmul.f32 %v2012_v11, %v519_v19  ;;  %v1329_v48 = vunpack.c.h.bf16 %v1338_v33  ;;  %v478_v49 = vld [vmem:[#allocation15 + $0x8] sm:$0xff] }
  0x83   : > { %vm1275_vm2 = vmpackc.low %vm2094_vm1, %vm2090_vm0  ;;  %v2136_v61 = vsel %vm2090_vm0, 1.0, %v1745_v60  ;;  %v2142_v0 = vsel %vm2094_vm1, 1.0, %v1745_v60  ;;  %v668_v59 = vmul.f32 %v2164_v38, %v478_v49 }
  0x84   : > { %v534_v14 = vadd.f32 %v2142_v0, %v532_v62 }
  0x85   : > { %629 = vmatpush1.bf16.msra.mxu0 %v2060_v36  ;;  %740 = vmatpush1.bf16.msra.mxu1 %v2060_v36 }
  0x86   : > { %630 = vmatprep.subr.bf16.mxu0 %v2064_v37  ;;  %741 = vmatprep.subr.bf16.mxu1 %v2064_v37  ;;  %v689_v23 = vsub.f32 %v2017_v12, %v534_v14  ;;  %v723_v33 = vmul.f32 0.9, %v534_v14 }
  0x88   : > { %v705_v27 = vmul.f32 %v689_v23, %v520_v22  ;;  %v691_v40 = vmul.f32 %v689_v23, %v2080_v47 }
  0x89   : > { %631 = vmatpush1.bf16.msra.mxu0 %v2070_v44  ;;  %742 = vmatpush1.bf16.msra.mxu1 %v2070_v44 }
  0x8a   : > { %632 = vmatprep.subr.bf16.mxu0 %v2074_v45  ;;  %743 = vmatprep.subr.bf16.mxu1 %v2074_v45  ;;  %v707_v28 = vadd.f32 %v705_v27, %v703_v25  ;;  %v695_v56 = vsub.f32 %v691_v40, %v693_v41  ;;  %v713_v25 = vadd.f32 1.0, %v534_v14 }
  0x8c   : > { %v709_v15 = vmul.f32 0.01, %v707_v28 }
  0x8d   : > { %633 = vmatpush1.bf16.msra.mxu0 %v2086_v50  ;;  %744 = vmatpush1.bf16.msra.mxu1 %v2086_v50 }
  0x8e   : > { %829 = vmatprep.subr.bf16.mxu0 %v1978_v1  ;;  %929 = vmatprep.subr.bf16.mxu1 %v1978_v1  ;;  %v533_v1 = vadd.f32 %v2136_v61, %v531_v58  ;;  %v2156_v32 = vadd.f32 %v709_v15, %v520_v22 }
  0x90   : > { %1276 = vmatmul.mubr.msk.bf16.vlgmr.msra.gmra.mrb[0].mxu0 %vm1275_vm2, %v1744_v53  ;;  %v688_v20 = vsub.f32 %v2017_v12, %v533_v1 }
  0x91   : > { %830 = vmatpush1.bf16.msra.mxu0 %v1980_v2  ;;  %861 = vmatprep.mubr.bf16.mxu0 %v1743_v3 }
  0x92   : > { %831 = vmatprep.subr.bf16.mxu0 %v1985_v4  ;;  %v704_v21 = vmul.f32 %v688_v20, %v519_v19  ;;  %v690_v34 = vmul.f32 %v688_v20, %v2077_v46 }
  0x94   : > { %v706_v24 = vadd.f32 %v704_v21, %v702_v18  ;;  %v694_v42 = vsub.f32 %v690_v34, %v692_v35  ;;  %v712_v21 = vadd.f32 1.0, %v533_v1 }
  0x95   : > { %832 = vmatpush1.bf16.msra.mxu0 %v1989_v5 }
  0x96   : > { %833 = vmatprep.subr.bf16.mxu0 %v1993_v6  ;;  %v708_v30 = vmul.f32 0.01, %v706_v24 }
  0x98   : > { %v2154_v31 = vadd.f32 %v708_v30, %v519_v19  ;;  %v722_v30 = vmul.f32 0.9, %v533_v1 }
  0x99   : > { %834 = vmatpush1.bf16.msra.mxu0 %v1997_v7 }
  0x9a   : > { %835 = vmatprep.subr.bf16.mxu0 %v2001_v8  ;;  %v792_v14 = vmul.f32 %v2012_v11, %v2154_v31 }
  0x9d   : > { %836 = vmatpush1.bf16.msra.mxu0 %v2004_v9 }
  0x9e   : > { %837 = vmatprep.subr.bf16.mxu0 %v2007_v10 }
  0xa1   : > { %838 = vmatpush1.bf16.msra.mxu0 %v2048_v26 }
  0xa2   : > { %839 = vmatprep.subr.bf16.mxu0 %v2052_v29 }
  0xa5   : > { %840 = vmatpush1.bf16.msra.mxu0 %v2060_v36 }
  0xa6   : > { %841 = vmatprep.subr.bf16.mxu0 %v2064_v37 }
  0xa9   : > { %842 = vmatpush1.bf16.msra.mxu0 %v2070_v44 }
  0xaa   : > { %843 = vmatprep.subr.bf16.mxu0 %v2074_v45 }
  0xad   : > { %844 = vmatpush1.bf16.msra.mxu0 %v2086_v50 }
 0x163   : > { %v652_v51 = vpop.f32.mrb[0].mxu0 }
 0x164   : > { %v686_v54 = vadd.f32 %v1328_v16, %v652_v51  ;;  %v654_v55 = vpop.f32.mrb[1].mxu0  ;;  %v793_v16 = vmul.f32 %v2012_v11, %v2156_v32 }
 0x165   : > { %v675_v57 = vmul.f32 %v2171_v43, %v654_v55  ;;  %v656_v58 = vpop.f32.mrb[2].mxu0 }
 0x166   : > { %v696_v62 = vadd.f32 %v694_v42, %v686_v54  ;;  %v687_v63 = vadd.f32 %v1329_v48, %v656_v58  ;;  %v658_v13 = vpop.f32.mrb[3].mxu0 }
 0x167   : > { %v2176_v17 = vadd.f32 %v675_v57, %v667_v52  ;;  %v676_v19 = vmul.f32 %v2171_v43, %v658_v13 }
 0x168   : > { %v698_v20 = vmul.f32 0.01, %v696_v62  ;;  %v697_v18 = vadd.f32 %v695_v56, %v687_v63 }
 0x169   : > { %679 = vst [vmem:[%s1975_s8] sm:$0xff] %v2176_v17  ;;  %v2181_v22 = vadd.f32 %v676_v19, %v668_v59 }
 0x16a   : > { %v2184_v23 = vadd.f32 %v698_v20, %v2077_v46  ;;  %v699_v24 = vmul.f32 0.01, %v697_v18 }
 0x16b   : > { %680 = vst [vmem:[%s1975_s8 + $0x8] sm:$0xff] %v2181_v22 }
 0x16c   : > { %v2189_v27 = vadd.f32 %v699_v24, %v2080_v47  ;;  %v714_v28 = vsub.f32 %v2184_v23, %v712_v21  ;;  %v802_v39 = vmul.f32 %v2012_v11, %v2184_v23 }
 0x16e   : > { %v715_v15 = vsub.f32 %v2189_v27, %v713_v25  ;;  %vm716_vm3 = vcmp.gt.f32.partialorder %v714_v28, 0.0  ;;  %v803_v48 = vmul.f32 %v2012_v11, %v2189_v27 }
 0x16f   : > { %v2194_v34 = vsel %vm716_vm3, 1.0, %v1745_v60 }
 0x170   : > { %vm717_vm4 = vcmp.gt.f32.partialorder %v715_v15, 0.0  ;;  %v2197_v46 = vadd.f32 %v2194_v34, %v722_v30  ;;  %v726_v21 = vadd.f32 %v2194_v34, %v2136_v61 }
 0x171   : > { %v2200_v35 = vsel %vm717_vm4, 1.0, %v1745_v60  ;;  %vm1283_vm5 = vmpackc.low %vm717_vm4, %vm716_vm3 }
 0x172   : > { %v2203_v47 = vadd.f32 %v2200_v35, %v723_v33  ;;  %1284 = vmatmul.mubr.msk.bf16.vlgmr.msra.gmra.mrb[0].mxu1 %vm1283_vm5, %v1744_v53  ;;  %v788_v1 = vsub.f32 %v2017_v12, %v2197_v46  ;;  %v822_v24 = vmul.f32 0.9, %v2197_v46 }
 0x173   : > { %930 = vmatpush1.bf16.msra.mxu1 %v1980_v2  ;;  %961 = vmatprep.mubr.bf16.mxu1 %v1743_v3 }
 0x174   : > { %v790_v40 = vmul.f32 %v788_v1, %v2184_v23  ;;  %v804_v41 = vmul.f32 %v788_v1, %v2154_v31  ;;  %v789_v42 = vsub.f32 %v2017_v12, %v2203_v47  ;;  %931 = vmatprep.subr.bf16.mxu1 %v1985_v4  ;;  %v813_v20 = vadd.f32 1.0, %v2203_v47 }
 0x176   : > { %v794_v49 = vsub.f32 %v790_v40, %v792_v14  ;;  %v806_v51 = vadd.f32 %v804_v41, %v802_v39  ;;  %v791_v2 = vmul.f32 %v789_v42, %v2189_v27  ;;  %v805_v3 = vmul.f32 %v789_v42, %v2156_v32 }
 0x177   : > { %932 = vmatpush1.bf16.msra.mxu1 %v1989_v5  ;;  %v1339_v5 = vld [vmem:[%s1964_s26 + $0x10] sm:$0xff]  }
 0x178   : > { %v795_v52 = vsub.f32 %v791_v2, %v793_v16  ;;  %v807_v54 = vadd.f32 %v805_v3, %v803_v48  ;;  %933 = vmatprep.subr.bf16.mxu1 %v1993_v6  ;;  %v808_v55 = vmul.f32 0.01, %v806_v51  ;;  %v1332_v6 = vunpack.c.l.bf16 %v1339_v5  ;;  %v1340_v48 = vld [vmem:[%s1964_s26 + $0x18] sm:$0xff]  }
 0x179   : > { %v1337_v2 = vunpack.c.h.bf16 %v1340_v48 }
 0x17a   : > { %v2228_v56 = vadd.f32 %v808_v55, %v2154_v31  ;;  %v809_v4 = vmul.f32 0.01, %v807_v54 }
 0x17b   : > { %934 = vmatpush1.bf16.msra.mxu1 %v1997_v7  ;;  %v1333_v7 = vunpack.c.h.bf16 %v1339_v5 }
 0x17c   : > { %935 = vmatprep.subr.bf16.mxu1 %v2001_v8  ;;  %v2233_v57 = vadd.f32 %v809_v4, %v2156_v32 }
 0x17e   : > { %v893_v5 = vmul.f32 %v2012_v11, %v2233_v57 }
 0x17f   : > { %936 = vmatpush1.bf16.msra.mxu1 %v2004_v9 }
 0x180   : > { %937 = vmatprep.subr.bf16.mxu1 %v2007_v10 }
 0x183   : > { %938 = vmatpush1.bf16.msra.mxu1 %v2048_v26  ;;  %v772_v26 = vmul.f32 %v2164_v38, %v2176_v17  ;;  %v812_v17 = vadd.f32 1.0, %v2197_v46 }
 0x184   : > { %939 = vmatprep.subr.bf16.mxu1 %v2052_v29 }
 0x187   : > { %940 = vmatpush1.bf16.msra.mxu1 %v2060_v36 }
 0x188   : > { %941 = vmatprep.subr.bf16.mxu1 %v2064_v37 }
 0x18b   : > { %942 = vmatpush1.bf16.msra.mxu1 %v2070_v44 }
 0x18c   : > { %943 = vmatprep.subr.bf16.mxu1 %v2074_v45 }
 0x18f   : > { %944 = vmatpush1.bf16.msra.mxu1 %v2086_v50  ;;  %v773_v50 = vmul.f32 %v2164_v38, %v2181_v22 }
 0x245   : > { %v763_v8 = vpop.f32.mrb[0].mxu1 }
 0x246   : > { %v786_v9 = vadd.f32 %v1332_v6, %v763_v8  ;;  %v765_v10 = vpop.f32.mrb[1].mxu1 }
 0x247   : > { %v774_v29 = vmul.f32 %v2171_v43, %v765_v10  ;;  %v767_v36 = vpop.f32.mrb[2].mxu1 }
 0x248   : > { %v796_v37 = vadd.f32 %v794_v49, %v786_v9  ;;  %v787_v44 = vadd.f32 %v1333_v7, %v767_v36  ;;  %v769_v31 = vpop.f32.mrb[3].mxu1  ;;  %v1336_v49 = vunpack.c.l.bf16 %v1340_v48 }
 0x249   : > { %v776_v45 = vadd.f32 %v774_v29, %v772_v26  ;;  %v775_v32 = vmul.f32 %v2171_v43, %v769_v31 }
 0x24a   : > { %v798_v58 = vmul.f32 0.01, %v796_v37  ;;  %v797_v59 = vadd.f32 %v795_v52, %v787_v44 }
 0x24b   : > { %1285 = vst [vmem:[%s1975_s8 + $0x10] sm:$0xff] %v776_v45  ;;  %v777_v62 = vadd.f32 %v775_v32, %v773_v50  ;;  %v872_v6 = vmul.f32 %v2164_v38, %v776_v45 }
 0x24c   : > { %v800_v63 = vadd.f32 %v798_v58, %v2184_v23  ;;  %v799_v13 = vmul.f32 0.01, %v797_v59  ;;  %v727_v23 = vadd.f32 %v2200_v35, %v2142_v0 }
 0x24d   : > { %1286 = vst [vmem:[%s1975_s8 + $0x18] sm:$0xff] %v777_v62  ;;  %v873_v36 = vmul.f32 %v2164_v38, %v777_v62 }
 0x24e   : > { %v2256_v19 = vadd.f32 %v799_v13, %v2189_v27  ;;  %v814_v18 = vsub.f32 %v800_v63, %v812_v17  ;;  %v823_v27 = vmul.f32 0.9, %v2203_v47  ;;  %v902_v0 = vmul.f32 %v2012_v11, %v800_v63 }
 0x250   : > { %v815_v22 = vsub.f32 %v2256_v19, %v813_v20  ;;  %vm816_vm6 = vcmp.gt.f32.partialorder %v814_v18, 0.0  ;;  %v903_v47 = vmul.f32 %v2012_v11, %v2256_v19  ;;  %v993_v20 = vld [vmem:[#allocation4] sm:$0xff] }
 0x251   : > { %v1289_v25 = vsel %vm816_vm6, 1.0, %v1745_v60 }
 0x252   : > { %vm817_vm7 = vcmp.gt.f32.partialorder %v815_v22, 0.0  ;;  %v824_v28 = vadd.f32 %v1289_v25, %v822_v24  ;;  %v826_v30 = vadd.f32 %v1289_v25, %v726_v21  ;;  %v994_v24 = vld [vmem:[#allocation4 + $0x8] sm:$0xff] }
 0x253   : > { %v1290_v15 = vsel %vm817_vm7, 1.0, %v1745_v60  ;;  %vm1291_vm8 = vmpackc.low %vm817_vm7, %vm816_vm6 }
 0x254   : > { %v825_v33 = vadd.f32 %v1290_v15, %v823_v27  ;;  %v2268_v61 = vadd.f32 %v1290_v15, %v727_v23  ;;  %1292 = vmatmul.mubr.msk.bf16.vlgmr.msra.gmra.mrb[4].mxu0 %vm1291_vm8, %v1744_v53  ;;  %v888_v34 = vsub.f32 %v2017_v12, %v824_v28  ;;  %v922_v17 = vmul.f32 0.9, %v824_v28 }
 0x256   : > { %v904_v46 = vmul.f32 %v888_v34, %v2228_v56  ;;  %v889_v35 = vsub.f32 %v2017_v12, %v825_v33  ;;  %v890_v51 = vmul.f32 %v888_v34, %v800_v63  ;;  %v892_v12 = vmul.f32 %v2012_v11, %v2228_v56 }
 0x257   : > { %v913_v59 = vadd.f32 1.0, %v825_v33  ;;  %v923_v18 = vmul.f32 0.9, %v825_v33 }
 0x258   : > { %v906_v1 = vadd.f32 %v904_v46, %v902_v0  ;;  %v905_v14 = vmul.f32 %v889_v35, %v2233_v57  ;;  %v891_v3 = vmul.f32 %v889_v35, %v2256_v19  ;;  %v894_v55 = vsub.f32 %v890_v51, %v892_v12 }
 0x25a   : > { %v908_v16 = vmul.f32 0.01, %v906_v1  ;;  %v907_v39 = vadd.f32 %v905_v14, %v903_v47 }
 0x25c   : > { %v910_v40 = vadd.f32 %v908_v16, %v2228_v56  ;;  %v909_v41 = vmul.f32 0.01, %v907_v39  ;;  %v895_v56 = vsub.f32 %v891_v3, %v893_v5 }
 0x25e   : > { %987 = vst [vmem:[#allocation2] sm:$0xff] %v910_v40  ;;  %v911_v42 = vadd.f32 %v909_v41, %v2233_v57  ;;  %v912_v57 = vadd.f32 1.0, %v824_v28 }
 0x260   : > { %988 = vst [vmem:[#allocation2 + $0x8] sm:$0xff] %v911_v42 }
 0x327   : > { %v863_v52 = vpop.f32.mrb[4].mxu0 }
 0x328   : > { %v886_v54 = vadd.f32 %v1336_v49, %v863_v52  ;;  %v865_v4 = vpop.f32.mrb[5].mxu0 }
 0x329   : > { %v874_v7 = vmul.f32 %v2171_v43, %v865_v4  ;;  %v867_v8 = vpop.f32.mrb[6].mxu0 }
 0x32a   : > { %v896_v9 = vadd.f32 %v894_v55, %v886_v54  ;;  %v887_v10 = vadd.f32 %v1337_v2, %v867_v8  ;;  %v869_v26 = vpop.f32.mrb[7].mxu0 }
 0x32b   : > { %v876_v29 = vadd.f32 %v874_v7, %v872_v6  ;;  %v875_v37 = vmul.f32 %v2171_v43, %v869_v26 }
 0x32c   : > { %v898_v44 = vmul.f32 0.01, %v896_v9  ;;  %v897_v31 = vadd.f32 %v895_v56, %v887_v10 }
 0x32d   : > { %1293 = vst [vmem:[%s1975_s8 + $0x20] sm:$0xff] %v876_v29  ;;  %v877_v50 = vadd.f32 %v875_v37, %v873_v36 }
 0x32e   : > { %v900_v11 = vadd.f32 %v898_v44, %v800_v63  ;;  %v899_v45 = vmul.f32 0.01, %v897_v31 }
 0x32f   : > { %1294 = vst [vmem:[%s1975_s8 + $0x28] sm:$0xff] %v877_v50  ;;  %v973_v34 = vmul.f32 %v2164_v38, %v877_v50 }
 0x330   : > { %v914_v32 = vsub.f32 %v900_v11, %v912_v57  ;;  %983 = vst [vmem:[#allocation14] sm:$0xff] %v900_v11  ;;  %v901_v58 = vadd.f32 %v899_v45, %v2256_v19 }
 0x332   : > { %v915_v13 = vsub.f32 %v901_v58, %v913_v59  ;;  %984 = vst [vmem:[#allocation14 + $0x8] sm:$0xff] %v901_v58  ;;  %vm916_vm9 = vcmp.gt.f32.partialorder %v914_v32, 0.0 }
 0x333   : > { %v1297_v62 = vsel %vm916_vm9, 1.0, %v1745_v60 }
 0x334   : > { %vm917_vm10 = vcmp.gt.f32.partialorder %v915_v13, 0.0  ;;  %v924_v21 = vadd.f32 %v1297_v62, %v922_v17  ;;  %v926_v22 = vadd.f32 %v1297_v62, %v826_v30  ;;  %981 = vst [vmem:[#allocation12] sm:$0xff] %v1297_v62 }
 0x335   : > { %v1298_v63 = vsel %vm917_vm10, 1.0, %v1745_v60  ;;  %vm1299_vm11 = vmpackc.low %vm917_vm10, %vm916_vm9  ;;  %v972_v60 = vmul.f32 %v2164_v38, %v876_v29 }
 0x336   : > { %v925_v23 = vadd.f32 %v1298_v63, %v923_v18  ;;  %v927_v19 = vadd.f32 %v1298_v63, %v2268_v61  ;;  %1300 = vmatmul.mubr.msk.bf16.vlgmr.msra.gmra.mrb[4].mxu1 %vm1299_vm11, %v1744_v53  ;;  %982 = vst [vmem:[#allocation12 + $0x8] sm:$0xff] %v1298_v63  ;;  %989 = vst [vmem:[#allocation3] sm:$0xff] %v924_v21  ;;  %v995_v25 = vadd.f32 %v993_v20, %v926_v22 }
 0x338   : > { %990 = vst [vmem:[#allocation3 + $0x8] sm:$0xff] %v925_v23  ;;  %v996_v27 = vadd.f32 %v994_v24, %v927_v19  ;;  %997 = vst [vmem:[#allocation4] sm:$0xff] %v995_v25 }
 0x33a   : > { %998 = vst [vmem:[#allocation4 + $0x8] sm:$0xff] %v996_v27  ;;  %v1003_v35 = vadd.f32 (!%p1303_p6), %v996_v27, %v995_v25 }
 0x33c   : > { %1004 = vadd.xlane.f32.xlu0 (!%p1303_p6), %v1003_v35 }
 0x3c9   : > { %v1005_v47 = vpop.xlane.xlu0 (!%p1303_p6), %1004 }
 0x3ca   : > { %v1006_v1 = vrot.slane (!%p1303_p6), %v1005_v47, 4 }
 0x3cc   : > { %v1007_v14 = vadd.f32 (!%p1303_p6), %v1006_v1, %v1005_v47 }
 0x3ce   : > { %v1008_v16 = vrot.slane (!%p1303_p6), %v1007_v14, 2 }
 0x3d0   : > { %v1009_v39 = vadd.f32 (!%p1303_p6), %v1008_v16, %v1007_v14 }
 0x3d2   : > { %v1010_v40 = vrot.slane (!%p1303_p6), %v1009_v39, 1 }
 0x3d4   : > { %v1011_v41 = vadd.f32 (!%p1303_p6), %v1010_v40, %v1009_v39 }
 0x3d6   : > { %1341 = vpush (!%p1303_p6), %v1011_v41 }
 0x407   : > { %s1342_s27 = spop (!%p1303_p6), %1341 }
 0x408   : > { %v1013_v38 = vstv (!%p1303_p6), %s1342_s27 }
 0x409   : > { %v963_v28 = vpop.f32.mrb[4].mxu1  ;;  %1015 = vst.msk [vmem:[#allocation17] sm:$0x1] (!%p1303_p6), %vm1014_vm12, %v1013_v38 }
 0x40a   : > { %991 = vst [vmem:[#allocation5] sm:$0xff] %v963_v28  ;;  %v965_v30 = vpop.f32.mrb[5].mxu1 }
 0x40b   : > { %v974_v15 = vmul.f32 %v2171_v43, %v965_v30  ;;  %v967_v33 = vpop.f32.mrb[6].mxu1  ;;  %1002 = sbr.rel (%p1303_p6) target bundleno = 1042 (0x412), region = 60 }
 0x40c   : > { %992 = vst [vmem:[#allocation5 + $0x8] sm:$0xff] %v967_v33  ;;  %v969_v61 = vpop.f32.mrb[7].mxu1 }
 0x40d   : > { %v976_v53 = vadd.f32 %v974_v15, %v972_v60  ;;  %v975_v0 = vmul.f32 %v2171_v43, %v969_v61 }
 0x40f   : > { %1301 = vst [vmem:[%s1975_s8 + $0x30] sm:$0xff] %v976_v53  ;;  %985 = vst [vmem:[#allocation15] sm:$0xff] %v976_v53  ;;  %v977_v46 = vadd.f32 %v975_v0, %v973_v34 }
 0x411   : > { %1302 = vst [vmem:[%s1975_s8 + $0x38] sm:$0xff] %v977_v46  ;;  %986 = vst [vmem:[#allocation15 + $0x8] sm:$0xff] %v977_v46 }
 0x412 PF: > { %s1746_s10 = smov [#allocation12]   ;;  %s1747_s1 = smov [#allocation15]  }
 0x413   : > { %s1049_s26 = sshll.u32 %s1746_s10, 4  ;;  %s1081_s21 = sshll.u32 %s1747_s1, 4  ;;  %s1050_s26 = int_to_ptr.vmem [resolvable:$true] %s1049_s26  ;;  %s1082_s21 = int_to_ptr.vmem [resolvable:$true] %s1081_s21 }
 0x414   : > { %s1536_s23 = scalar_lea.vmem %s1050_s26, 256  ;;  %p2503_p12 = scmp.ne.s32.totalorder %s2485_s22, 0 }
 0x415   : > { %p1537_p8 = scmp.ne.s32.totalorder %s1050_s26, %s1536_s23  ;;  %p1543_p5 = scmp.lt.s32.totalorder %s1050_s26, %s1050_s26 }
 0x416   : > { %p1544_p9 = scmp.lt.s32.totalorder %s1536_s23, %s1536_s23 }
 0x417   : > { %p1538_p11 = pnand %p1537_p8, %p2503_p12 }
 0x418   : > { %p1545_p1 = por %p1544_p9, %p1543_p5 }
 0x419   : > { %p1539_p0 = pneg %p1538_p11 }
 0x41b   : > { %p1546_p2 = pnand %p1545_p1, %p1539_p0 }
 0x41d   : > { %1549 = shalt.err (!%p1546_p2)
}
 0x41e   : > { %s1550_s13 = scalar_lea.hbm %s2467_s7, 256 }
 0x41f   : > { %p1551_p3 = scmp.ne.s32.totalorder %s2467_s7, %s1550_s13  ;;  %p1556_p4 = scmp.lt.u32.totalorder %s1550_s13, %s2467_s7 }
 0x421   : > { %p1552_p7 = pnand %p1551_p3, %p2503_p12 }
 0x423   : > { %p1553_p13 = pneg %p1552_p7 }
 0x425   : > { %p1558_p6 = pnand %p1556_p4, %p1553_p13 }
 0x427   : > { %1561 = shalt.err (!%p1558_p6)
}
 0x428   : > { %s1748_s10 = smov 128   ;;  %s1749_s1 = smov 8  }
 0x429   : > { %1351 = dma.vmem_to_hbm [thread:$0]  (%p2503_p12), %s1050_s26, 256, %s2467_s7, [#allocation13], %s1748_s10, %s1748_s10, %s1749_s1  }
 0x42a   : > { %s1562_s28 = scalar_lea.vmem %s1082_s21, 256  ;;  %p1569_p5 = scmp.lt.s32.totalorder %s1082_s21, %s1082_s21 }
 0x42b   : > { %p1563_p8 = scmp.ne.s32.totalorder %s1082_s21, %s1562_s28  ;;  %p1570_p9 = scmp.lt.s32.totalorder %s1562_s28, %s1562_s28 }
 0x42d   : > { %p1564_p11 = pnand %p1563_p8, %p2503_p12  ;;  %p1571_p1 = por %p1570_p9, %p1569_p5 }
 0x42f   : > { %p1565_p0 = pneg %p1564_p11 }
 0x431   : > { %p1572_p2 = pnand %p1571_p1, %p1565_p0 }
 0x433   : > { %1575 = shalt.err (!%p1572_p2)
}
 0x434   : > { %s1576_s11 = scalar_lea.hbm %s2469_s9, 256 }
 0x435   : > { %p1577_p3 = scmp.ne.s32.totalorder %s2469_s9, %s1576_s11  ;;  %p1582_p4 = scmp.lt.u32.totalorder %s1576_s11, %s2469_s9 }
 0x437   : > { %p1578_p7 = pnand %p1577_p3, %p2503_p12 }
 0x439   : > { %p1579_p13 = pneg %p1578_p7 }
 0x43b   : > { %p1584_p6 = pnand %p1582_p4, %p1579_p13 }
 0x43d   : > { %1587 = shalt.err (!%p1584_p6)
}
 0x43e   : > { %1355 = dma.vmem_to_hbm [thread:$0]  (%p2503_p12), %s1082_s21, 256, %s2469_s9, [#allocation16], %s1748_s10, %s1748_s10, %s1749_s1  }
 0x43f   : > { %s1321_s13 = sshll.u32 %s1726_s16, 10  ;;  %s1033_s24 = sshll.u32 %s1975_s8, 4  ;;  %s2353_s24 = int_to_ptr.vmem [resolvable:$true] %s1033_s24 }
 0x440   : > { %s2351_s11 = scalar_lea.hbm %s2466_s6, %s1321_s13  ;;  %s1017_s26 = scalar_lea.sflag [#allocation8], %s1960_s12 }
 0x441   : > { %s1588_s23 = scalar_lea.vmem %s2353_s24, 1024  ;;  %s1750_s25 = smov [#allocation11]  }
 0x442   : > { %p1589_p8 = scmp.ne.s32.totalorder %s2353_s24, %s1588_s23  ;;  %s1592_s21 = sshll.u32 %s1750_s25, 4  ;;  %s1593_s21 = int_to_ptr.vmem [resolvable:$false] %s1592_s21 }
 0x443   : > { %s1594_s16 = scalar_lea.vmem %s1593_s21, 2048  ;;  %p1595_p5 = scmp.lt.s32.totalorder %s2353_s24, %s1593_s21 }
 0x444   : > { %p1590_p11 = pnand %p1589_p8, %p1904_p10  ;;  %p1596_p9 = scmp.lt.s32.totalorder %s1594_s16, %s1588_s23 }
 0x446   : > { %p1591_p0 = pneg %p1590_p11  ;;  %p1597_p1 = por %p1596_p9, %p1595_p5 }
 0x448   : > { %p1598_p2 = pnand %p1597_p1, %p1591_p0 }
 0x44a   : > { %1601 = shalt.err (!%p1598_p2)
}
 0x44b   : > { %s1602_s8 = scalar_lea.hbm %s2351_s11, 1024  ;;  %s1606_s19 = scalar_lea.hbm %s2466_s6, 2048 }
 0x44c   : > { %p1603_p3 = scmp.ne.s32.totalorder %s2351_s11, %s1602_s8  ;;  %p1607_p4 = scmp.lt.u32.totalorder %s2351_s11, %s2466_s6 }
 0x44d   : > { %p1608_p6 = scmp.lt.u32.totalorder %s1606_s19, %s1602_s8  ;;  %p1610_p11 = scmp.lt.u32.totalorder %s1602_s8, %s2351_s11 }
 0x44e   : > { %p1604_p7 = pnand %p1603_p3, %p1904_p10 }
 0x44f   : > { %p1609_p8 = por %p1608_p6, %p1607_p4 }
 0x450   : > { %p1605_p13 = pneg %p1604_p7 }
 0x451   : > { %p1611_p0 = por %p1610_p11, %p1609_p8 }
 0x453   : > { %p1612_p5 = pnand %p1611_p0, %p1605_p13 }
 0x455   : > { %1615 = shalt.err (!%p1612_p5)
}
 0x456   : > { %1349 = dma.vmem_to_hbm [thread:$0]  (%p1904_p10), %s2353_s24, 1024, %s2351_s11, %s1017_s26, %s1748_s10, %s1748_s10, %s1749_s1  }
 0x457   : > { %s1751_s23 = smov [#allocation14]   ;;  %s1752_s16 = smov [#allocation17]  }
 0x458   : > { %s1065_s21 = sshll.u32 %s1751_s23, 4  ;;  %s1097_s28 = sshll.u32 %s1752_s16, 4  ;;  %s1066_s21 = int_to_ptr.vmem [resolvable:$true] %s1065_s21  ;;  %s2382_s28 = int_to_ptr.vmem [resolvable:$true] %s1097_s28 }
 0x459   : > { %s1616_s8 = scalar_lea.vmem %s1066_s21, 256  ;;  %p1623_p3 = scmp.lt.s32.totalorder %s1066_s21, %s1066_s21 }
 0x45a   : > { %p1617_p9 = scmp.ne.s32.totalorder %s1066_s21, %s1616_s8  ;;  %p1624_p7 = scmp.lt.s32.totalorder %s1616_s8, %s1616_s8 }
 0x45c   : > { %p1618_p1 = pnand %p1617_p9, %p2503_p12  ;;  %p1625_p13 = por %p1624_p7, %p1623_p3 }
 0x45e   : > { %p1619_p2 = pneg %p1618_p1 }
 0x460   : > { %p1626_p4 = pnand %p1625_p13, %p1619_p2 }
 0x462   : > { %1629 = shalt.err (!%p1626_p4)
}
 0x463   : > { %s2504_s24 = sld [smem:[#allocation26_spill]] }
 0x469   : > { %s1630_s11 = scalar_lea.hbm %s2504_s24, 256 }
 0x46a   : > { %p1631_p10 = scmp.ne.s32.totalorder %s2504_s24, %s1630_s11  ;;  %p1636_p11 = scmp.lt.u32.totalorder %s1630_s11, %s2504_s24 }
 0x46c   : > { %p1632_p6 = pnand %p1631_p10, %p2503_p12 }
 0x46e   : > { %p1633_p8 = pneg %p1632_p6 }
 0x470   : > { %p1638_p0 = pnand %p1636_p11, %p1633_p8 }
 0x472   : > { %1641 = shalt.err (!%p1638_p0)
}
 0x473   : > { %1353 = dma.vmem_to_hbm [thread:$0]  (%p2503_p12), %s1066_s21, 256, %s2504_s24, [#allocation13], %s1748_s10, %s1748_s10, %s1749_s1  }
 0x474   : > { %s1642_s16 = scalar_lea.vmem %s2382_s28, 16  ;;  %s1648_s8 = scalar_lea.vmem %s2382_s28, 32 }
 0x475   : > { %p1643_p5 = scmp.ne.s32.totalorder %s2382_s28, %s1642_s16  ;;  %p1649_p2 = scmp.lt.s32.totalorder %s2382_s28, %s2382_s28 }
 0x476   : > { %p1650_p3 = scmp.lt.s32.totalorder %s1648_s8, %s1642_s16 }
 0x477   : > { %p1644_p9 = pnand %p1643_p5, %p2503_p12 }
 0x478   : > { %p1651_p7 = por %p1650_p3, %p1649_p2 }
 0x479   : > { %p1645_p1 = pneg %p1644_p9 }
 0x47b   : > { %p1652_p13 = pnand %p1651_p7, %p1645_p1 }
 0x47d   : > { %1655 = shalt.err (!%p1652_p13)
}
 0x47e   : > { %s2505_s11 = sld [smem:[#allocation27_spill]] }
 0x484   : > { %s1656_s26 = scalar_lea.hbm %s2505_s11, 16 }
 0x485   : > { %p1657_p4 = scmp.ne.s32.totalorder %s2505_s11, %s1656_s26  ;;  %p1662_p8 = scmp.lt.u32.totalorder %s1656_s26, %s2505_s11 }
 0x487   : > { %p1658_p10 = pnand %p1657_p4, %p2503_p12 }
 0x489   : > { %p1659_p6 = pneg %p1658_p10 }
 0x48b   : > { %p1664_p11 = pnand %p1662_p8, %p1659_p6 }
 0x48d   : > { %1667 = shalt.err (!%p1664_p11)
}
 0x48e   : > { %1357 = dma.vmem_to_hbm [thread:$0]  (%p2503_p12), %s2382_s28, 16, %s2505_s11, [#allocation16]  }
 0x48f   : > { %1701 = dma.done.wait (%p2503_p12), [#allocation13], 512  }
 0x490   : > { %1703 = vsyncadd (%p2503_p12), [#allocation13], 4294966784 }
 0x491   : > { %1705 = dma.done.wait (%p2503_p12), [#allocation16], 272  }
 0x492   : > { %1707 = vsyncadd (%p2503_p12), [#allocation16], 4294967024 }
 0x493 PF: > { %s2506_s25 = sld [smem:[#allocation23_spill]]  ;;  %s2507_s23 = sld [smem:[#allocation24_spill]] }
 0x494   : > { %p2509_p5 = scmp.ge.s32.totalorder %s1734_s18, 2 }
 0x499   : > { %s1125_s16 = sand.u32 1, %s2506_s25   ;;  %p2508_p0 = scmp.ne.s32.totalorder %s2507_s23, 0 }
 0x49a   : > { %s1126_s28 = scalar_lea.sflag [#allocation8], %s1125_s16 }
 0x49b   : > { %p1376_p9 = pnand %p2509_p5, %p2508_p0 }
 0x49d   : > { %1709 = dma.done.wait (!%p1376_p9), %s1126_s28, 1024  }
 0x49e   : > { %1711 = vsyncadd (!%p1376_p9), %s1126_s28, 4294966272  ;;  %s30_s18 = sadd.s32 1, %s1734_s18   ;;  %s2510_s13 = smov %s1718_s14 }
 0x49f   : > { %p27_p1 = scmp.ge.s32.totalorder %s30_s18, 4   ;;  %s2511_s14 = smov %s1722_s15 }
 0x4a0   : > { %s2512_s15 = smov %s1913_s30  ;;  %s2513_s16 = smov %s1730_s17 }
 0x4a1   : > { %s2514_s17 = smov %s2516_s29  ;;  %29 = sbr.rel (!%p27_p1) target bundleno = 13 (0xd), region = 143 }
 0x4a8   :  { %1131 = vsyncpa [#allocation7], 1 }
 0x4a9   :  { %1133 = vsyncpa [#allocation7 + $0x1], 1 }
 0x4aa   :  { %1134 = vsyncpa [#allocation10], 1 }
 0x4ab   :  { %1135 = vsyncpa [#allocation8], 1 }
 0x4ac   :  { %1137 = vsyncpa [#allocation8 + $0x1], 1 }
 0x4ad   :  { %1138 = vsyncpa [#allocation13], 1 }
 0x4ae   :  { %1139 = vsyncpa [#allocation16], 1 }

</bundles_post_ra>
